<compile_context>
chip_gen: v5e
topology: v5e:2x2
jax: 0.10.0
libtpu: 0.0.40
codegen_flags: <defaults>
</compile_context>

<pallas_src>
import functools

import jax
import jax.numpy as jnp
import numpy as np
from jax import lax
from jax.experimental import pallas as pl
from jax.experimental.pallas import tpu as pltpu

HIDDEN_DIM = 32
INPUT_DIM = 1
NUM_LAYERS = 2
OUTPUT_DIM = 1
FUTURE_LOOK = 4   # default 0 in the module makes forward degenerate (cat of []); use 4.
GROUP_B = 8       # sequences per grid step = 8 sublanes (full vreg occupancy)


def _lstm_kernel(x_ref, w_ref, u8_ref, bfirst_ref, ball_ref, wfc_ref, bfc_ref,
                 out_ref, *, seq_len, future_look, hidden_dim):
    H = hidden_dim
    G2 = 2 * H                     # width of one gate group (= state width [l0|l1])
    B = x_ref.shape[1]

    W = w_ref[...]                 # (2H, 8H) fused two-layer weight (gate-grouped cols)
    u8 = u8_ref[...]               # (1, 8H)  x_t coefficient (layer-0 slots only)
    b_first = bfirst_ref[...]      # (1, 8H)  layer-0 bias only (pipeline not primed yet)
    b_all = ball_ref[...]          # (1, 8H)  layer-0 + layer-1 biases
    wfc = wfc_ref[...]             # (1, H)   fc.weight
    bfc = bfc_ref[...]             # (1, 1)   fc.bias

    # Hoisted: pre-broadcast the per-step bias once (no per-iter broadcast_in_dim).
    b_all_b = jnp.broadcast_to(b_all, (B, 8 * H))

    def combined_cell(gates, c):
        # gates columns: [F | I | O | G], each 2H wide = [layer-0 (lanes 0:H) | layer-1].
        # f/i/o columns were pre-scaled by 0.5 on the host, so a single full-width
        # tanh yields tanh(x/2) there; sigmoid(x) == 0.5*tanh(x/2) + 0.5.
        th = jnp.tanh(gates)                       # one EUP push for both layers' gates
        f = 0.5 * th[:, 0:G2] + 0.5
        i = 0.5 * th[:, G2:2 * G2] + 0.5
        o = 0.5 * th[:, 2 * G2:3 * G2] + 0.5
        g = th[:, 3 * G2:4 * G2]
        c_new = f * c + i * g                      # (B, 2H) = [c0_t | c1_{t-1}]
        h_new = o * jnp.tanh(c_new)                # (B, 2H) = [h0_t | h1_{t-1}] = matmul LHS
        return h_new, c_new

    def fused_dot(h):
        # (B,2H)@(2H,8H): [l0 recurrent pre-gates for step t+1 | l1 pre-gates for step t]
        return jnp.dot(h, W, preferred_element_type=jnp.float32)

    def predict(h1):
        return jnp.sum(h1 * wfc, axis=-1, keepdims=True) + bfc    # (B, 1)

    # ---- step 0 (peeled): primes the layer pipeline -------------------------
    # Layer-1 lanes of u8/b_first are zero, so the layer-1 half of the cell
    # evaluates to exactly zero (g=tanh(0)=0, c=0, h=0), matching h1_{-1}=c1_{-1}=0.
    x0 = x_ref[0]                                  # (B, 1)
    gates = x0 * u8 + b_first
    h, c = combined_cell(gates, jnp.zeros((B, G2), jnp.float32))
    gp = fused_dot(h)

    # ---- steps 1 .. seq-1 over real inputs (one fused matmul per step) ------
    def body(t, carry):
        gp, c = carry
        x_t = x_ref[t]                             # (B, 1), dynamic leading index
        gates = gp + x_t * u8 + b_all_b            # l0 gates step t | l1 gates step t-1
        h, c = combined_cell(gates, c)
        return fused_dot(h), c

    n_loop = seq_len - 1
    unroll = n_loop if 0 < n_loop <= 16 else 4
    gp, c = lax.fori_loop(1, seq_len, body, (gp, c), unroll=max(unroll, 1))

    # ---- future_look feedback steps (small static tail) ---------------------
    # Pipeline state here: gp holds l0 pre-gates for step seq+k and l1 pre-gates
    # for step seq-1+k;  c = [c0_{seq-1+k} | c1_{seq-2+k}].
    preds = []
    for k in range(future_look):
        # Drain the layer-1 half: h1 of LSTM step seq-1+k -> prediction y_k.
        # (Layer-0 lanes lack their still-unknown input y_k; only h1 lanes are read.)
        h_tmp, _ = combined_cell(gp + b_all_b, c)
        y = predict(h_tmp[:, H:G2])
        preds.append(y)
        if k + 1 < future_look:
            # Feed y_k back as the layer-0 input of step seq+k and advance one step
            # (layer-1 lanes are recomputed bit-identically; cheap, static tail).
            gates = gp + y * u8 + b_all_b
            h, c = combined_cell(gates, c)
            gp = fused_dot(h)

    # future_look << 128 lanes -> masked partial store; fine at this size.
    out_ref[...] = jnp.concatenate(preds, axis=1)              # (B, future_look)


def _pack_params(params, H):
    """Build the fused (2H, 8H) weight + (1, 8H) input/bias rows.

    Column layout (8H): [F | I | O | G], each 2H wide = [layer-0 (H) | layer-1 (H)].
    f/i/o columns are pre-scaled by 0.5 so sigmoid(x) = 0.5*tanh(x/2)+0.5 needs a
    single full-width tanh in the kernel; g columns are unscaled (plain tanh).
    Row layout (2H): rows 0:H multiply h0_t, rows H:2H multiply h1_{t-1}.
    """
    (wih0, whh0, bih0, bhh0, wih1, whh1, bih1, bhh1, _wfc, _bfc) = params
    f32 = jnp.float32

    def split(m):   # (4H, X) in PyTorch gate order i, f, g, o -> per-gate (H, X)
        return dict(i=m[0:H], f=m[H:2 * H], g=m[2 * H:3 * H], o=m[3 * H:4 * H])

    gate_order = ("f", "i", "o", "g")
    scale = dict(f=0.5, i=0.5, o=0.5, g=1.0)

    hh0 = split(whh0.astype(f32))
    ih1 = split(wih1.astype(f32))
    hh1 = split(whh1.astype(f32))
    ih0 = split(wih0.astype(f32))                        # (H, 1) blocks
    b0 = split((bih0 + bhh0).astype(f32)[:, None])       # (H, 1) blocks
    b1 = split((bih1 + bhh1).astype(f32)[:, None])

    rows_h0, rows_h1, u_cols, bfirst_cols, ball_cols = [], [], [], [], []
    zH = jnp.zeros((H, H), f32)
    z1 = jnp.zeros((1, H), f32)
    for g in gate_order:
        s = scale[g]
        # layer-0 sub-block of this gate group
        rows_h0.append(s * hh0[g].T)        # h0_t -> layer-0 recurrent gates (step t+1)
        rows_h1.append(zH)                  # h1 contributes nothing to layer-0 gates
        u_cols.append(s * ih0[g].T)         # x_t coefficient
        bfirst_cols.append(s * b0[g].T)
        ball_cols.append(s * b0[g].T)
        # layer-1 sub-block of this gate group
        rows_h0.append(s * ih1[g].T)        # h0_t is layer-1's input
        rows_h1.append(s * hh1[g].T)        # h1_{t-1} recurrent part
        u_cols.append(z1)                   # x_t does not feed layer-1 directly
        bfirst_cols.append(z1)              # step 0: pipeline not primed -> no l1 bias
        ball_cols.append(s * b1[g].T)

    W = jnp.concatenate([jnp.concatenate(rows_h0, axis=1),
                         jnp.concatenate(rows_h1, axis=1)], axis=0)    # (2H, 8H)
    u8 = jnp.concatenate(u_cols, axis=1)                               # (1, 8H)
    b_first = jnp.concatenate(bfirst_cols, axis=1)                     # (1, 8H)
    b_all = jnp.concatenate(ball_cols, axis=1)                         # (1, 8H)
    return W, u8, b_first, b_all


def lstm_forward(x, params, *, future_look=FUTURE_LOOK, hidden_dim=HIDDEN_DIM):
    """x: (B, seq, 1) float32  ->  (B, future_look, 1) float32."""
    if future_look < 1:
        raise ValueError("future_look must be >= 1 (PyTorch forward would cat an empty list).")
    B, seq, in_dim = x.shape
    assert in_dim == 1
    H = hidden_dim

    # Pad batch to a multiple of 8 (full sublane use); each grid step handles 8
    # independent sequences, and the grid axis is "parallel" (v7x 2nd core).
    Bpad = ((B + GROUP_B - 1) // GROUP_B) * GROUP_B
    x_tm = jnp.transpose(x.astype(jnp.float32), (1, 0, 2))     # (seq, B, 1) time-major
    if Bpad != B:
        x_tm = jnp.pad(x_tm, ((0, 0), (0, Bpad - B), (0, 0)))

    W, u8, b_first, b_all = _pack_params(params, H)
    wfc = params[8].reshape(1, H).astype(jnp.float32)
    bfc = params[9].reshape(1, 1).astype(jnp.float32)

    kernel = functools.partial(_lstm_kernel, seq_len=seq, future_look=future_look,
                               hidden_dim=H)
    out = pl.pallas_call(
        kernel,
        grid=(Bpad // GROUP_B,),
        in_specs=[
            pl.BlockSpec((seq, GROUP_B, 1), lambda b: (0, b, 0)),    # x (time-major)
            pl.BlockSpec((2 * H, 8 * H), lambda b: (0, 0)),          # fused weight
            pl.BlockSpec((1, 8 * H), lambda b: (0, 0)),              # u8
            pl.BlockSpec((1, 8 * H), lambda b: (0, 0)),              # b_first
            pl.BlockSpec((1, 8 * H), lambda b: (0, 0)),              # b_all
            pl.BlockSpec((1, H), lambda b: (0, 0)),                  # fc weight
            pl.BlockSpec((1, 1), lambda b: (0, 0)),                  # fc bias
        ],
        out_specs=pl.BlockSpec((GROUP_B, future_look), lambda b: (b, 0)),
        out_shape=jax.ShapeDtypeStruct((Bpad, future_look), jnp.float32),
        compiler_params=pltpu.CompilerParams(dimension_semantics=("parallel",)),
    )(x_tm, W, u8, b_first, b_all, wfc, bfc)
    return out[:B].reshape(B, future_look, 1)


# ---------------- pure-JAX reference (literal PyTorch semantics) ----------------
def _ref_lstm_layer(xs, wih, whh, bih, bhh, H):
    B = xs.shape[0]
    h = jnp.zeros((B, H), jnp.float32)
    c = jnp.zeros((B, H), jnp.float32)
    outs = []
    for t in range(xs.shape[1]):
        gates = xs[:, t] @ wih.T + h @ whh.T + bih + bhh
        i = jax.nn.sigmoid(gates[:, 0:H])
        f = jax.nn.sigmoid(gates[:, H:2 * H])
        g = jnp.tanh(gates[:, 2 * H:3 * H])
        o = jax.nn.sigmoid(gates[:, 3 * H:4 * H])
        c = f * c + i * g
        h = o * jnp.tanh(c)
        outs.append(h)
    return jnp.stack(outs, axis=1)


def lstm_forward_ref(x, params, *, future_look=FUTURE_LOOK, hidden_dim=HIDDEN_DIM):
    (wih0, whh0, bih0, bhh0, wih1, whh1, bih1, bhh1, wfc, bfc) = params
    outputs = []
    for _ in range(future_look):
        h1_seq = _ref_lstm_layer(x, wih0, whh0, bih0, bhh0, hidden_dim)
        h2_seq = _ref_lstm_layer(h1_seq, wih1, whh1, bih1, bhh1, hidden_dim)
        y = h2_seq[:, -1, :] @ wfc.T + bfc        # (B, 1)
        outputs.append(y)
        x = jnp.concatenate([x, y[:, :, None]], axis=1)
    return jnp.concatenate(outputs, axis=1)[:, :, None]


def init_params(key, input_dim=INPUT_DIM, hidden_dim=HIDDEN_DIM, output_dim=OUTPUT_DIM):
    """PyTorch-style uniform(-1/sqrt(H), 1/sqrt(H)) init, deterministic."""
    k = 1.0 / np.sqrt(hidden_dim)
    keys = jax.random.split(key, 10)
    u = lambda kk, shape: jax.random.uniform(kk, shape, jnp.float32, -k, k)
    return (
        u(keys[0], (4 * hidden_dim, input_dim)),    # W_ih_l0
        u(keys[1], (4 * hidden_dim, hidden_dim)),   # W_hh_l0
        u(keys[2], (4 * hidden_dim,)),              # b_ih_l0
        u(keys[3], (4 * hidden_dim,)),              # b_hh_l0
        u(keys[4], (4 * hidden_dim, hidden_dim)),   # W_ih_l1
        u(keys[5], (4 * hidden_dim, hidden_dim)),   # W_hh_l1
        u(keys[6], (4 * hidden_dim,)),              # b_ih_l1
        u(keys[7], (4 * hidden_dim,)),              # b_hh_l1
        u(keys[8], (output_dim, hidden_dim)),       # fc.weight
        u(keys[9], (output_dim,)),                  # fc.bias
    )


if __name__ == "__main__":
    key = jax.random.PRNGKey(0)
    kx, kp = jax.random.split(key)

    # 8 independent sequences in one call: fills all 8 sublanes of every vreg.
    B, SEQ = 8, 8
    x = jax.random.normal(kx, (B, SEQ, INPUT_DIM), jnp.float32)
    params = init_params(kp)

    out = lstm_forward(x, params)
    out = jax.block_until_ready(out)
    assert out.shape == (B, FUTURE_LOOK, 1), out.shape

    ref = lstm_forward_ref(x, params)
    # Kernel computes sigmoid via the exact identity 0.5*tanh(x/2)+0.5 (single EUP
    # push) and fuses the per-step matmuls, so summation order / last-ulp rounding
    # differs slightly from the reference -> modest tolerance.
    np.testing.assert_allclose(np.asarray(out), np.asarray(ref), rtol=1e-3, atol=1e-4)

    # TODO(synk): save_model/load_model (torch.save / torch.load) are file I/O, not kernel work.
    print("KERNEL_OK")
</pallas_src>

<mosaic_0001>
module attributes {stable_mosaic.version = 11 : i64} {
  func.func @_lstm_kernel(%arg0: i32, %arg1: memref<8x8x1xf32, #tpu.memory_space<vmem>>, %arg2: memref<64x256xf32, #tpu.memory_space<vmem>>, %arg3: memref<1x256xf32, #tpu.memory_space<vmem>>, %arg4: memref<1x256xf32, #tpu.memory_space<vmem>>, %arg5: memref<1x256xf32, #tpu.memory_space<vmem>>, %arg6: memref<1x32xf32, #tpu.memory_space<vmem>>, %arg7: memref<1x1xf32, #tpu.memory_space<vmem>>, %arg8: memref<8x4xf32, #tpu.memory_space<vmem>>) attributes {dimension_semantics = [#tpu.dimension_semantics<parallel>], iteration_bounds = array<i64: 1>, scalar_prefetch = 0 : i64, scratch_operands = 0 : i64, tpu.core_type = #tpu.core_type<tc>, window_params = [{transform_indices = @transform_0, window_bounds = array<i64: 8, 8, 1>}, {pipeline_mode = #tpu.pipeline_mode<synchronous>, transform_indices = @transform_1, window_bounds = array<i64: 64, 256>}, {pipeline_mode = #tpu.pipeline_mode<synchronous>, transform_indices = @transform_2, window_bounds = array<i64: 1, 256>}, {pipeline_mode = #tpu.pipeline_mode<synchronous>, transform_indices = @transform_3, window_bounds = array<i64: 1, 256>}, {pipeline_mode = #tpu.pipeline_mode<synchronous>, transform_indices = @transform_4, window_bounds = array<i64: 1, 256>}, {pipeline_mode = #tpu.pipeline_mode<synchronous>, transform_indices = @transform_5, window_bounds = array<i64: 1, 32>}, {pipeline_mode = #tpu.pipeline_mode<synchronous>, transform_indices = @transform_6, window_bounds = array<i64: 1, 1>}, {transform_indices = @transform_7, window_bounds = array<i64: 8, 4>}]} {
    %c0 = arith.constant 0 : index
    %c0_0 = arith.constant 0 : index
    %0 = vector.load %arg2[%c0, %c0_0] : memref<64x256xf32, #tpu.memory_space<vmem>>, vector<64x256xf32>
    %c0_1 = arith.constant 0 : index
    %c0_2 = arith.constant 0 : index
    %1 = vector.load %arg3[%c0_1, %c0_2] : memref<1x256xf32, #tpu.memory_space<vmem>>, vector<1x256xf32>
    %c0_3 = arith.constant 0 : index
    %c0_4 = arith.constant 0 : index
    %2 = vector.load %arg4[%c0_3, %c0_4] : memref<1x256xf32, #tpu.memory_space<vmem>>, vector<1x256xf32>
    %c0_5 = arith.constant 0 : index
    %c0_6 = arith.constant 0 : index
    %3 = vector.load %arg5[%c0_5, %c0_6] : memref<1x256xf32, #tpu.memory_space<vmem>>, vector<1x256xf32>
    %c0_7 = arith.constant 0 : index
    %c0_8 = arith.constant 0 : index
    %4 = vector.load %arg6[%c0_7, %c0_8] : memref<1x32xf32, #tpu.memory_space<vmem>>, vector<1x32xf32>
    %c0_9 = arith.constant 0 : index
    %c0_10 = arith.constant 0 : index
    %5 = vector.load %arg7[%c0_9, %c0_10] : memref<1x1xf32, #tpu.memory_space<vmem>>, vector<1x1xf32>
    %6 = vector.shape_cast %3 : vector<1x256xf32> to vector<1x256xf32>
    %7 = vector.broadcast %6 : vector<1x256xf32> to vector<8x256xf32>
    %c0_11 = arith.constant 0 : index
    %c0_12 = arith.constant 0 : index
    %c0_13 = arith.constant 0 : index
    %8 = vector.load %arg1[%c0_11, %c0_12, %c0_13] : memref<8x8x1xf32, #tpu.memory_space<vmem>>, vector<1x8x1xf32>
    %9 = vector.shape_cast %8 : vector<1x8x1xf32> to vector<8x1xf32>
    %10 = vector.broadcast %9 : vector<8x1xf32> to vector<8x256xf32>
    %11 = vector.broadcast %1 : vector<1x256xf32> to vector<8x256xf32>
    %12 = arith.mulf %10, %11 : vector<8x256xf32>
    %13 = vector.broadcast %2 : vector<1x256xf32> to vector<8x256xf32>
    %14 = arith.addf %12, %13 : vector<8x256xf32>
    %cst = arith.constant 0.000000e+00 : f32
    %15 = vector.broadcast %cst : f32 to vector<8x64xf32>
    %16 = math.tanh %14 : vector<8x256xf32>
    %17 = vector.extract_strided_slice %16 {offsets = [0, 0], sizes = [8, 64], strides = [1, 1]} : vector<8x256xf32> to vector<8x64xf32>
    %cst_14 = arith.constant 5.000000e-01 : f32
    %18 = vector.broadcast %cst_14 : f32 to vector<8x64xf32>
    %19 = arith.mulf %18, %17 : vector<8x64xf32>
    %cst_15 = arith.constant 5.000000e-01 : f32
    %20 = vector.broadcast %cst_15 : f32 to vector<8x64xf32>
    %21 = arith.addf %19, %20 : vector<8x64xf32>
    %22 = vector.extract_strided_slice %16 {offsets = [0, 64], sizes = [8, 64], strides = [1, 1]} : vector<8x256xf32> to vector<8x64xf32>
    %cst_16 = arith.constant 5.000000e-01 : f32
    %23 = vector.broadcast %cst_16 : f32 to vector<8x64xf32>
    %24 = arith.mulf %23, %22 : vector<8x64xf32>
    %cst_17 = arith.constant 5.000000e-01 : f32
    %25 = vector.broadcast %cst_17 : f32 to vector<8x64xf32>
    %26 = arith.addf %24, %25 : vector<8x64xf32>
    %27 = vector.extract_strided_slice %16 {offsets = [0, 128], sizes = [8, 64], strides = [1, 1]} : vector<8x256xf32> to vector<8x64xf32>
    %cst_18 = arith.constant 5.000000e-01 : f32
    %28 = vector.broadcast %cst_18 : f32 to vector<8x64xf32>
    %29 = arith.mulf %28, %27 : vector<8x64xf32>
    %cst_19 = arith.constant 5.000000e-01 : f32
    %30 = vector.broadcast %cst_19 : f32 to vector<8x64xf32>
    %31 = arith.addf %29, %30 : vector<8x64xf32>
    %32 = vector.extract_strided_slice %16 {offsets = [0, 192], sizes = [8, 64], strides = [1, 1]} : vector<8x256xf32> to vector<8x64xf32>
    %33 = arith.mulf %21, %15 : vector<8x64xf32>
    %34 = arith.mulf %26, %32 : vector<8x64xf32>
    %35 = arith.addf %33, %34 : vector<8x64xf32>
    %36 = math.tanh %35 : vector<8x64xf32>
    %37 = arith.mulf %31, %36 : vector<8x64xf32>
    %cst_20 = arith.constant dense<0.000000e+00> : vector<8x256xf32>
    %38 = tpu.matmul %37, %0, %cst_20 {dimension_numbers = #tpu.dot_dimension_numbers<[1], [0], [0], [1], [0, 0, 1, 1], [], []>} : vector<8x64xf32>, vector<64x256xf32>, vector<8x256xf32> -> vector<8x256xf32>
    %c1_i32 = arith.constant 1 : i32
    %39 = arith.index_cast %c1_i32 : i32 to index
    %c0_21 = arith.constant 0 : index
    %c0_22 = arith.constant 0 : index
    %40 = vector.load %arg1[%39, %c0_21, %c0_22] : memref<8x8x1xf32, #tpu.memory_space<vmem>>, vector<1x8x1xf32>
    %41 = vector.shape_cast %40 : vector<1x8x1xf32> to vector<8x1xf32>
    %42 = vector.broadcast %41 : vector<8x1xf32> to vector<8x256xf32>
    %43 = vector.broadcast %1 : vector<1x256xf32> to vector<8x256xf32>
    %44 = arith.mulf %42, %43 : vector<8x256xf32>
    %45 = arith.addf %38, %44 : vector<8x256xf32>
    %46 = arith.addf %45, %7 : vector<8x256xf32>
    %47 = math.tanh %46 : vector<8x256xf32>
    %48 = vector.extract_strided_slice %47 {offsets = [0, 0], sizes = [8, 64], strides = [1, 1]} : vector<8x256xf32> to vector<8x64xf32>
    %cst_23 = arith.constant 5.000000e-01 : f32
    %49 = vector.broadcast %cst_23 : f32 to vector<8x64xf32>
    %50 = arith.mulf %49, %48 : vector<8x64xf32>
    %cst_24 = arith.constant 5.000000e-01 : f32
    %51 = vector.broadcast %cst_24 : f32 to vector<8x64xf32>
    %52 = arith.addf %50, %51 : vector<8x64xf32>
    %53 = vector.extract_strided_slice %47 {offsets = [0, 64], sizes = [8, 64], strides = [1, 1]} : vector<8x256xf32> to vector<8x64xf32>
    %cst_25 = arith.constant 5.000000e-01 : f32
    %54 = vector.broadcast %cst_25 : f32 to vector<8x64xf32>
    %55 = arith.mulf %54, %53 : vector<8x64xf32>
    %cst_26 = arith.constant 5.000000e-01 : f32
    %56 = vector.broadcast %cst_26 : f32 to vector<8x64xf32>
    %57 = arith.addf %55, %56 : vector<8x64xf32>
    %58 = vector.extract_strided_slice %47 {offsets = [0, 128], sizes = [8, 64], strides = [1, 1]} : vector<8x256xf32> to vector<8x64xf32>
    %cst_27 = arith.constant 5.000000e-01 : f32
    %59 = vector.broadcast %cst_27 : f32 to vector<8x64xf32>
    %60 = arith.mulf %59, %58 : vector<8x64xf32>
    %cst_28 = arith.constant 5.000000e-01 : f32
    %61 = vector.broadcast %cst_28 : f32 to vector<8x64xf32>
    %62 = arith.addf %60, %61 : vector<8x64xf32>
    %63 = vector.extract_strided_slice %47 {offsets = [0, 192], sizes = [8, 64], strides = [1, 1]} : vector<8x256xf32> to vector<8x64xf32>
    %64 = arith.mulf %52, %35 : vector<8x64xf32>
    %65 = arith.mulf %57, %63 : vector<8x64xf32>
    %66 = arith.addf %64, %65 : vector<8x64xf32>
    %67 = math.tanh %66 : vector<8x64xf32>
    %68 = arith.mulf %62, %67 : vector<8x64xf32>
    %cst_29 = arith.constant dense<0.000000e+00> : vector<8x256xf32>
    %69 = tpu.matmul %68, %0, %cst_29 {dimension_numbers = #tpu.dot_dimension_numbers<[1], [0], [0], [1], [0, 0, 1, 1], [], []>} : vector<8x64xf32>, vector<64x256xf32>, vector<8x256xf32> -> vector<8x256xf32>
    %c2_i32 = arith.constant 2 : i32
    %70 = arith.index_cast %c2_i32 : i32 to index
    %c0_30 = arith.constant 0 : index
    %c0_31 = arith.constant 0 : index
    %71 = vector.load %arg1[%70, %c0_30, %c0_31] : memref<8x8x1xf32, #tpu.memory_space<vmem>>, vector<1x8x1xf32>
    %72 = vector.shape_cast %71 : vector<1x8x1xf32> to vector<8x1xf32>
    %73 = vector.broadcast %72 : vector<8x1xf32> to vector<8x256xf32>
    %74 = vector.broadcast %1 : vector<1x256xf32> to vector<8x256xf32>
    %75 = arith.mulf %73, %74 : vector<8x256xf32>
    %76 = arith.addf %69, %75 : vector<8x256xf32>
    %77 = arith.addf %76, %7 : vector<8x256xf32>
    %78 = math.tanh %77 : vector<8x256xf32>
    %79 = vector.extract_strided_slice %78 {offsets = [0, 0], sizes = [8, 64], strides = [1, 1]} : vector<8x256xf32> to vector<8x64xf32>
    %cst_32 = arith.constant 5.000000e-01 : f32
    %80 = vector.broadcast %cst_32 : f32 to vector<8x64xf32>
    %81 = arith.mulf %80, %79 : vector<8x64xf32>
    %cst_33 = arith.constant 5.000000e-01 : f32
    %82 = vector.broadcast %cst_33 : f32 to vector<8x64xf32>
    %83 = arith.addf %81, %82 : vector<8x64xf32>
    %84 = vector.extract_strided_slice %78 {offsets = [0, 64], sizes = [8, 64], strides = [1, 1]} : vector<8x256xf32> to vector<8x64xf32>
    %cst_34 = arith.constant 5.000000e-01 : f32
    %85 = vector.broadcast %cst_34 : f32 to vector<8x64xf32>
    %86 = arith.mulf %85, %84 : vector<8x64xf32>
    %cst_35 = arith.constant 5.000000e-01 : f32
    %87 = vector.broadcast %cst_35 : f32 to vector<8x64xf32>
    %88 = arith.addf %86, %87 : vector<8x64xf32>
    %89 = vector.extract_strided_slice %78 {offsets = [0, 128], sizes = [8, 64], strides = [1, 1]} : vector<8x256xf32> to vector<8x64xf32>
    %cst_36 = arith.constant 5.000000e-01 : f32
    %90 = vector.broadcast %cst_36 : f32 to vector<8x64xf32>
    %91 = arith.mulf %90, %89 : vector<8x64xf32>
    %cst_37 = arith.constant 5.000000e-01 : f32
    %92 = vector.broadcast %cst_37 : f32 to vector<8x64xf32>
    %93 = arith.addf %91, %92 : vector<8x64xf32>
    %94 = vector.extract_strided_slice %78 {offsets = [0, 192], sizes = [8, 64], strides = [1, 1]} : vector<8x256xf32> to vector<8x64xf32>
    %95 = arith.mulf %83, %66 : vector<8x64xf32>
    %96 = arith.mulf %88, %94 : vector<8x64xf32>
    %97 = arith.addf %95, %96 : vector<8x64xf32>
    %98 = math.tanh %97 : vector<8x64xf32>
    %99 = arith.mulf %93, %98 : vector<8x64xf32>
    %cst_38 = arith.constant dense<0.000000e+00> : vector<8x256xf32>
    %100 = tpu.matmul %99, %0, %cst_38 {dimension_numbers = #tpu.dot_dimension_numbers<[1], [0], [0], [1], [0, 0, 1, 1], [], []>} : vector<8x64xf32>, vector<64x256xf32>, vector<8x256xf32> -> vector<8x256xf32>
    %c3_i32 = arith.constant 3 : i32
    %101 = arith.index_cast %c3_i32 : i32 to index
    %c0_39 = arith.constant 0 : index
    %c0_40 = arith.constant 0 : index
    %102 = vector.load %arg1[%101, %c0_39, %c0_40] : memref<8x8x1xf32, #tpu.memory_space<vmem>>, vector<1x8x1xf32>
    %103 = vector.shape_cast %102 : vector<1x8x1xf32> to vector<8x1xf32>
    %104 = vector.broadcast %103 : vector<8x1xf32> to vector<8x256xf32>
    %105 = vector.broadcast %1 : vector<1x256xf32> to vector<8x256xf32>
    %106 = arith.mulf %104, %105 : vector<8x256xf32>
    %107 = arith.addf %100, %106 : vector<8x256xf32>
    %108 = arith.addf %107, %7 : vector<8x256xf32>
    %109 = math.tanh %108 : vector<8x256xf32>
    %110 = vector.extract_strided_slice %109 {offsets = [0, 0], sizes = [8, 64], strides = [1, 1]} : vector<8x256xf32> to vector<8x64xf32>
    %cst_41 = arith.constant 5.000000e-01 : f32
    %111 = vector.broadcast %cst_41 : f32 to vector<8x64xf32>
    %112 = arith.mulf %111, %110 : vector<8x64xf32>
    %cst_42 = arith.constant 5.000000e-01 : f32
    %113 = vector.broadcast %cst_42 : f32 to vector<8x64xf32>
    %114 = arith.addf %112, %113 : vector<8x64xf32>
    %115 = vector.extract_strided_slice %109 {offsets = [0, 64], sizes = [8, 64], strides = [1, 1]} : vector<8x256xf32> to vector<8x64xf32>
    %cst_43 = arith.constant 5.000000e-01 : f32
    %116 = vector.broadcast %cst_43 : f32 to vector<8x64xf32>
    %117 = arith.mulf %116, %115 : vector<8x64xf32>
    %cst_44 = arith.constant 5.000000e-01 : f32
    %118 = vector.broadcast %cst_44 : f32 to vector<8x64xf32>
    %119 = arith.addf %117, %118 : vector<8x64xf32>
    %120 = vector.extract_strided_slice %109 {offsets = [0, 128], sizes = [8, 64], strides = [1, 1]} : vector<8x256xf32> to vector<8x64xf32>
    %cst_45 = arith.constant 5.000000e-01 : f32
    %121 = vector.broadcast %cst_45 : f32 to vector<8x64xf32>
    %122 = arith.mulf %121, %120 : vector<8x64xf32>
    %cst_46 = arith.constant 5.000000e-01 : f32
    %123 = vector.broadcast %cst_46 : f32 to vector<8x64xf32>
    %124 = arith.addf %122, %123 : vector<8x64xf32>
    %125 = vector.extract_strided_slice %109 {offsets = [0, 192], sizes = [8, 64], strides = [1, 1]} : vector<8x256xf32> to vector<8x64xf32>
    %126 = arith.mulf %114, %97 : vector<8x64xf32>
    %127 = arith.mulf %119, %125 : vector<8x64xf32>
    %128 = arith.addf %126, %127 : vector<8x64xf32>
    %129 = math.tanh %128 : vector<8x64xf32>
    %130 = arith.mulf %124, %129 : vector<8x64xf32>
    %cst_47 = arith.constant dense<0.000000e+00> : vector<8x256xf32>
    %131 = tpu.matmul %130, %0, %cst_47 {dimension_numbers = #tpu.dot_dimension_numbers<[1], [0], [0], [1], [0, 0, 1, 1], [], []>} : vector<8x64xf32>, vector<64x256xf32>, vector<8x256xf32> -> vector<8x256xf32>
    %c4_i32 = arith.constant 4 : i32
    %132 = arith.index_cast %c4_i32 : i32 to index
    %c0_48 = arith.constant 0 : index
    %c0_49 = arith.constant 0 : index
    %133 = vector.load %arg1[%132, %c0_48, %c0_49] : memref<8x8x1xf32, #tpu.memory_space<vmem>>, vector<1x8x1xf32>
    %134 = vector.shape_cast %133 : vector<1x8x1xf32> to vector<8x1xf32>
    %135 = vector.broadcast %134 : vector<8x1xf32> to vector<8x256xf32>
    %136 = vector.broadcast %1 : vector<1x256xf32> to vector<8x256xf32>
    %137 = arith.mulf %135, %136 : vector<8x256xf32>
    %138 = arith.addf %131, %137 : vector<8x256xf32>
    %139 = arith.addf %138, %7 : vector<8x256xf32>
    %140 = math.tanh %139 : vector<8x256xf32>
    %141 = vector.extract_strided_slice %140 {offsets = [0, 0], sizes = [8, 64], strides = [1, 1]} : vector<8x256xf32> to vector<8x64xf32>
    %cst_50 = arith.constant 5.000000e-01 : f32
    %142 = vector.broadcast %cst_50 : f32 to vector<8x64xf32>
    %143 = arith.mulf %142, %141 : vector<8x64xf32>
    %cst_51 = arith.constant 5.000000e-01 : f32
    %144 = vector.broadcast %cst_51 : f32 to vector<8x64xf32>
    %145 = arith.addf %143, %144 : vector<8x64xf32>
    %146 = vector.extract_strided_slice %140 {offsets = [0, 64], sizes = [8, 64], strides = [1, 1]} : vector<8x256xf32> to vector<8x64xf32>
    %cst_52 = arith.constant 5.000000e-01 : f32
    %147 = vector.broadcast %cst_52 : f32 to vector<8x64xf32>
    %148 = arith.mulf %147, %146 : vector<8x64xf32>
    %cst_53 = arith.constant 5.000000e-01 : f32
    %149 = vector.broadcast %cst_53 : f32 to vector<8x64xf32>
    %150 = arith.addf %148, %149 : vector<8x64xf32>
    %151 = vector.extract_strided_slice %140 {offsets = [0, 128], sizes = [8, 64], strides = [1, 1]} : vector<8x256xf32> to vector<8x64xf32>
    %cst_54 = arith.constant 5.000000e-01 : f32
    %152 = vector.broadcast %cst_54 : f32 to vector<8x64xf32>
    %153 = arith.mulf %152, %151 : vector<8x64xf32>
    %cst_55 = arith.constant 5.000000e-01 : f32
    %154 = vector.broadcast %cst_55 : f32 to vector<8x64xf32>
    %155 = arith.addf %153, %154 : vector<8x64xf32>
    %156 = vector.extract_strided_slice %140 {offsets = [0, 192], sizes = [8, 64], strides = [1, 1]} : vector<8x256xf32> to vector<8x64xf32>
    %157 = arith.mulf %145, %128 : vector<8x64xf32>
    %158 = arith.mulf %150, %156 : vector<8x64xf32>
    %159 = arith.addf %157, %158 : vector<8x64xf32>
    %160 = math.tanh %159 : vector<8x64xf32>
    %161 = arith.mulf %155, %160 : vector<8x64xf32>
    %cst_56 = arith.constant dense<0.000000e+00> : vector<8x256xf32>
    %162 = tpu.matmul %161, %0, %cst_56 {dimension_numbers = #tpu.dot_dimension_numbers<[1], [0], [0], [1], [0, 0, 1, 1], [], []>} : vector<8x64xf32>, vector<64x256xf32>, vector<8x256xf32> -> vector<8x256xf32>
    %c5_i32 = arith.constant 5 : i32
    %163 = arith.index_cast %c5_i32 : i32 to index
    %c0_57 = arith.constant 0 : index
    %c0_58 = arith.constant 0 : index
    %164 = vector.load %arg1[%163, %c0_57, %c0_58] : memref<8x8x1xf32, #tpu.memory_space<vmem>>, vector<1x8x1xf32>
    %165 = vector.shape_cast %164 : vector<1x8x1xf32> to vector<8x1xf32>
    %166 = vector.broadcast %165 : vector<8x1xf32> to vector<8x256xf32>
    %167 = vector.broadcast %1 : vector<1x256xf32> to vector<8x256xf32>
    %168 = arith.mulf %166, %167 : vector<8x256xf32>
    %169 = arith.addf %162, %168 : vector<8x256xf32>
    %170 = arith.addf %169, %7 : vector<8x256xf32>
    %171 = math.tanh %170 : vector<8x256xf32>
    %172 = vector.extract_strided_slice %171 {offsets = [0, 0], sizes = [8, 64], strides = [1, 1]} : vector<8x256xf32> to vector<8x64xf32>
    %cst_59 = arith.constant 5.000000e-01 : f32
    %173 = vector.broadcast %cst_59 : f32 to vector<8x64xf32>
    %174 = arith.mulf %173, %172 : vector<8x64xf32>
    %cst_60 = arith.constant 5.000000e-01 : f32
    %175 = vector.broadcast %cst_60 : f32 to vector<8x64xf32>
    %176 = arith.addf %174, %175 : vector<8x64xf32>
    %177 = vector.extract_strided_slice %171 {offsets = [0, 64], sizes = [8, 64], strides = [1, 1]} : vector<8x256xf32> to vector<8x64xf32>
    %cst_61 = arith.constant 5.000000e-01 : f32
    %178 = vector.broadcast %cst_61 : f32 to vector<8x64xf32>
    %179 = arith.mulf %178, %177 : vector<8x64xf32>
    %cst_62 = arith.constant 5.000000e-01 : f32
    %180 = vector.broadcast %cst_62 : f32 to vector<8x64xf32>
    %181 = arith.addf %179, %180 : vector<8x64xf32>
    %182 = vector.extract_strided_slice %171 {offsets = [0, 128], sizes = [8, 64], strides = [1, 1]} : vector<8x256xf32> to vector<8x64xf32>
    %cst_63 = arith.constant 5.000000e-01 : f32
    %183 = vector.broadcast %cst_63 : f32 to vector<8x64xf32>
    %184 = arith.mulf %183, %182 : vector<8x64xf32>
    %cst_64 = arith.constant 5.000000e-01 : f32
    %185 = vector.broadcast %cst_64 : f32 to vector<8x64xf32>
    %186 = arith.addf %184, %185 : vector<8x64xf32>
    %187 = vector.extract_strided_slice %171 {offsets = [0, 192], sizes = [8, 64], strides = [1, 1]} : vector<8x256xf32> to vector<8x64xf32>
    %188 = arith.mulf %176, %159 : vector<8x64xf32>
    %189 = arith.mulf %181, %187 : vector<8x64xf32>
    %190 = arith.addf %188, %189 : vector<8x64xf32>
    %191 = math.tanh %190 : vector<8x64xf32>
    %192 = arith.mulf %186, %191 : vector<8x64xf32>
    %cst_65 = arith.constant dense<0.000000e+00> : vector<8x256xf32>
    %193 = tpu.matmul %192, %0, %cst_65 {dimension_numbers = #tpu.dot_dimension_numbers<[1], [0], [0], [1], [0, 0, 1, 1], [], []>} : vector<8x64xf32>, vector<64x256xf32>, vector<8x256xf32> -> vector<8x256xf32>
    %c6_i32 = arith.constant 6 : i32
    %194 = arith.index_cast %c6_i32 : i32 to index
    %c0_66 = arith.constant 0 : index
    %c0_67 = arith.constant 0 : index
    %195 = vector.load %arg1[%194, %c0_66, %c0_67] : memref<8x8x1xf32, #tpu.memory_space<vmem>>, vector<1x8x1xf32>
    %196 = vector.shape_cast %195 : vector<1x8x1xf32> to vector<8x1xf32>
    %197 = vector.broadcast %196 : vector<8x1xf32> to vector<8x256xf32>
    %198 = vector.broadcast %1 : vector<1x256xf32> to vector<8x256xf32>
    %199 = arith.mulf %197, %198 : vector<8x256xf32>
    %200 = arith.addf %193, %199 : vector<8x256xf32>
    %201 = arith.addf %200, %7 : vector<8x256xf32>
    %202 = math.tanh %201 : vector<8x256xf32>
    %203 = vector.extract_strided_slice %202 {offsets = [0, 0], sizes = [8, 64], strides = [1, 1]} : vector<8x256xf32> to vector<8x64xf32>
    %cst_68 = arith.constant 5.000000e-01 : f32
    %204 = vector.broadcast %cst_68 : f32 to vector<8x64xf32>
    %205 = arith.mulf %204, %203 : vector<8x64xf32>
    %cst_69 = arith.constant 5.000000e-01 : f32
    %206 = vector.broadcast %cst_69 : f32 to vector<8x64xf32>
    %207 = arith.addf %205, %206 : vector<8x64xf32>
    %208 = vector.extract_strided_slice %202 {offsets = [0, 64], sizes = [8, 64], strides = [1, 1]} : vector<8x256xf32> to vector<8x64xf32>
    %cst_70 = arith.constant 5.000000e-01 : f32
    %209 = vector.broadcast %cst_70 : f32 to vector<8x64xf32>
    %210 = arith.mulf %209, %208 : vector<8x64xf32>
    %cst_71 = arith.constant 5.000000e-01 : f32
    %211 = vector.broadcast %cst_71 : f32 to vector<8x64xf32>
    %212 = arith.addf %210, %211 : vector<8x64xf32>
    %213 = vector.extract_strided_slice %202 {offsets = [0, 128], sizes = [8, 64], strides = [1, 1]} : vector<8x256xf32> to vector<8x64xf32>
    %cst_72 = arith.constant 5.000000e-01 : f32
    %214 = vector.broadcast %cst_72 : f32 to vector<8x64xf32>
    %215 = arith.mulf %214, %213 : vector<8x64xf32>
    %cst_73 = arith.constant 5.000000e-01 : f32
    %216 = vector.broadcast %cst_73 : f32 to vector<8x64xf32>
    %217 = arith.addf %215, %216 : vector<8x64xf32>
    %218 = vector.extract_strided_slice %202 {offsets = [0, 192], sizes = [8, 64], strides = [1, 1]} : vector<8x256xf32> to vector<8x64xf32>
    %219 = arith.mulf %207, %190 : vector<8x64xf32>
    %220 = arith.mulf %212, %218 : vector<8x64xf32>
    %221 = arith.addf %219, %220 : vector<8x64xf32>
    %222 = math.tanh %221 : vector<8x64xf32>
    %223 = arith.mulf %217, %222 : vector<8x64xf32>
    %cst_74 = arith.constant dense<0.000000e+00> : vector<8x256xf32>
    %224 = tpu.matmul %223, %0, %cst_74 {dimension_numbers = #tpu.dot_dimension_numbers<[1], [0], [0], [1], [0, 0, 1, 1], [], []>} : vector<8x64xf32>, vector<64x256xf32>, vector<8x256xf32> -> vector<8x256xf32>
    %c7_i32 = arith.constant 7 : i32
    %225 = arith.index_cast %c7_i32 : i32 to index
    %c0_75 = arith.constant 0 : index
    %c0_76 = arith.constant 0 : index
    %226 = vector.load %arg1[%225, %c0_75, %c0_76] : memref<8x8x1xf32, #tpu.memory_space<vmem>>, vector<1x8x1xf32>
    %227 = vector.shape_cast %226 : vector<1x8x1xf32> to vector<8x1xf32>
    %228 = vector.broadcast %227 : vector<8x1xf32> to vector<8x256xf32>
    %229 = vector.broadcast %1 : vector<1x256xf32> to vector<8x256xf32>
    %230 = arith.mulf %228, %229 : vector<8x256xf32>
    %231 = arith.addf %224, %230 : vector<8x256xf32>
    %232 = arith.addf %231, %7 : vector<8x256xf32>
    %233 = math.tanh %232 : vector<8x256xf32>
    %234 = vector.extract_strided_slice %233 {offsets = [0, 0], sizes = [8, 64], strides = [1, 1]} : vector<8x256xf32> to vector<8x64xf32>
    %cst_77 = arith.constant 5.000000e-01 : f32
    %235 = vector.broadcast %cst_77 : f32 to vector<8x64xf32>
    %236 = arith.mulf %235, %234 : vector<8x64xf32>
    %cst_78 = arith.constant 5.000000e-01 : f32
    %237 = vector.broadcast %cst_78 : f32 to vector<8x64xf32>
    %238 = arith.addf %236, %237 : vector<8x64xf32>
    %239 = vector.extract_strided_slice %233 {offsets = [0, 64], sizes = [8, 64], strides = [1, 1]} : vector<8x256xf32> to vector<8x64xf32>
    %cst_79 = arith.constant 5.000000e-01 : f32
    %240 = vector.broadcast %cst_79 : f32 to vector<8x64xf32>
    %241 = arith.mulf %240, %239 : vector<8x64xf32>
    %cst_80 = arith.constant 5.000000e-01 : f32
    %242 = vector.broadcast %cst_80 : f32 to vector<8x64xf32>
    %243 = arith.addf %241, %242 : vector<8x64xf32>
    %244 = vector.extract_strided_slice %233 {offsets = [0, 128], sizes = [8, 64], strides = [1, 1]} : vector<8x256xf32> to vector<8x64xf32>
    %cst_81 = arith.constant 5.000000e-01 : f32
    %245 = vector.broadcast %cst_81 : f32 to vector<8x64xf32>
    %246 = arith.mulf %245, %244 : vector<8x64xf32>
    %cst_82 = arith.constant 5.000000e-01 : f32
    %247 = vector.broadcast %cst_82 : f32 to vector<8x64xf32>
    %248 = arith.addf %246, %247 : vector<8x64xf32>
    %249 = vector.extract_strided_slice %233 {offsets = [0, 192], sizes = [8, 64], strides = [1, 1]} : vector<8x256xf32> to vector<8x64xf32>
    %250 = arith.mulf %238, %221 : vector<8x64xf32>
    %251 = arith.mulf %243, %249 : vector<8x64xf32>
    %252 = arith.addf %250, %251 : vector<8x64xf32>
    %253 = math.tanh %252 : vector<8x64xf32>
    %254 = arith.mulf %248, %253 : vector<8x64xf32>
    %cst_83 = arith.constant dense<0.000000e+00> : vector<8x256xf32>
    %255 = tpu.matmul %254, %0, %cst_83 {dimension_numbers = #tpu.dot_dimension_numbers<[1], [0], [0], [1], [0, 0, 1, 1], [], []>} : vector<8x64xf32>, vector<64x256xf32>, vector<8x256xf32> -> vector<8x256xf32>
    %c7_i32_84 = arith.constant 7 : i32
    %256 = arith.addf %255, %7 : vector<8x256xf32>
    %257 = math.tanh %256 : vector<8x256xf32>
    %258 = vector.extract_strided_slice %257 {offsets = [0, 0], sizes = [8, 64], strides = [1, 1]} : vector<8x256xf32> to vector<8x64xf32>
    %cst_85 = arith.constant 5.000000e-01 : f32
    %259 = vector.broadcast %cst_85 : f32 to vector<8x64xf32>
    %260 = arith.mulf %259, %258 : vector<8x64xf32>
    %cst_86 = arith.constant 5.000000e-01 : f32
    %261 = vector.broadcast %cst_86 : f32 to vector<8x64xf32>
    %262 = arith.addf %260, %261 : vector<8x64xf32>
    %263 = vector.extract_strided_slice %257 {offsets = [0, 64], sizes = [8, 64], strides = [1, 1]} : vector<8x256xf32> to vector<8x64xf32>
    %cst_87 = arith.constant 5.000000e-01 : f32
    %264 = vector.broadcast %cst_87 : f32 to vector<8x64xf32>
    %265 = arith.mulf %264, %263 : vector<8x64xf32>
    %cst_88 = arith.constant 5.000000e-01 : f32
    %266 = vector.broadcast %cst_88 : f32 to vector<8x64xf32>
    %267 = arith.addf %265, %266 : vector<8x64xf32>
    %268 = vector.extract_strided_slice %257 {offsets = [0, 128], sizes = [8, 64], strides = [1, 1]} : vector<8x256xf32> to vector<8x64xf32>
    %cst_89 = arith.constant 5.000000e-01 : f32
    %269 = vector.broadcast %cst_89 : f32 to vector<8x64xf32>
    %270 = arith.mulf %269, %268 : vector<8x64xf32>
    %cst_90 = arith.constant 5.000000e-01 : f32
    %271 = vector.broadcast %cst_90 : f32 to vector<8x64xf32>
    %272 = arith.addf %270, %271 : vector<8x64xf32>
    %273 = vector.extract_strided_slice %257 {offsets = [0, 192], sizes = [8, 64], strides = [1, 1]} : vector<8x256xf32> to vector<8x64xf32>
    %274 = arith.mulf %262, %252 : vector<8x64xf32>
    %275 = arith.mulf %267, %273 : vector<8x64xf32>
    %276 = arith.addf %274, %275 : vector<8x64xf32>
    %277 = math.tanh %276 : vector<8x64xf32>
    %278 = arith.mulf %272, %277 : vector<8x64xf32>
    %279 = vector.extract_strided_slice %278 {offsets = [0, 32], sizes = [8, 32], strides = [1, 1]} : vector<8x64xf32> to vector<8x32xf32>
    %280 = vector.broadcast %4 : vector<1x32xf32> to vector<8x32xf32>
    %281 = arith.mulf %279, %280 : vector<8x32xf32>
    %cst_91 = arith.constant dense<0.000000e+00> : vector<8xf32>
    %282 = vector.multi_reduction <add>, %281, %cst_91 [1] : vector<8x32xf32> to vector<8xf32>
    %283 = vector.shape_cast %282 : vector<8xf32> to vector<8x1xf32>
    %284 = vector.broadcast %5 : vector<1x1xf32> to vector<8x1xf32>
    %285 = arith.addf %283, %284 : vector<8x1xf32>
    %286 = vector.broadcast %285 : vector<8x1xf32> to vector<8x256xf32>
    %287 = vector.broadcast %1 : vector<1x256xf32> to vector<8x256xf32>
    %288 = arith.mulf %286, %287 : vector<8x256xf32>
    %289 = arith.addf %255, %288 : vector<8x256xf32>
    %290 = arith.addf %289, %7 : vector<8x256xf32>
    %291 = math.tanh %290 : vector<8x256xf32>
    %292 = vector.extract_strided_slice %291 {offsets = [0, 0], sizes = [8, 64], strides = [1, 1]} : vector<8x256xf32> to vector<8x64xf32>
    %cst_92 = arith.constant 5.000000e-01 : f32
    %293 = vector.broadcast %cst_92 : f32 to vector<8x64xf32>
    %294 = arith.mulf %293, %292 : vector<8x64xf32>
    %cst_93 = arith.constant 5.000000e-01 : f32
    %295 = vector.broadcast %cst_93 : f32 to vector<8x64xf32>
    %296 = arith.addf %294, %295 : vector<8x64xf32>
    %297 = vector.extract_strided_slice %291 {offsets = [0, 64], sizes = [8, 64], strides = [1, 1]} : vector<8x256xf32> to vector<8x64xf32>
    %cst_94 = arith.constant 5.000000e-01 : f32
    %298 = vector.broadcast %cst_94 : f32 to vector<8x64xf32>
    %299 = arith.mulf %298, %297 : vector<8x64xf32>
    %cst_95 = arith.constant 5.000000e-01 : f32
    %300 = vector.broadcast %cst_95 : f32 to vector<8x64xf32>
    %301 = arith.addf %299, %300 : vector<8x64xf32>
    %302 = vector.extract_strided_slice %291 {offsets = [0, 128], sizes = [8, 64], strides = [1, 1]} : vector<8x256xf32> to vector<8x64xf32>
    %cst_96 = arith.constant 5.000000e-01 : f32
    %303 = vector.broadcast %cst_96 : f32 to vector<8x64xf32>
    %304 = arith.mulf %303, %302 : vector<8x64xf32>
    %cst_97 = arith.constant 5.000000e-01 : f32
    %305 = vector.broadcast %cst_97 : f32 to vector<8x64xf32>
    %306 = arith.addf %304, %305 : vector<8x64xf32>
    %307 = vector.extract_strided_slice %291 {offsets = [0, 192], sizes = [8, 64], strides = [1, 1]} : vector<8x256xf32> to vector<8x64xf32>
    %308 = arith.mulf %296, %252 : vector<8x64xf32>
    %309 = arith.mulf %301, %307 : vector<8x64xf32>
    %310 = arith.addf %308, %309 : vector<8x64xf32>
    %311 = math.tanh %310 : vector<8x64xf32>
    %312 = arith.mulf %306, %311 : vector<8x64xf32>
    %cst_98 = arith.constant dense<0.000000e+00> : vector<8x256xf32>
    %313 = tpu.matmul %312, %0, %cst_98 {dimension_numbers = #tpu.dot_dimension_numbers<[1], [0], [0], [1], [0, 0, 1, 1], [], []>} : vector<8x64xf32>, vector<64x256xf32>, vector<8x256xf32> -> vector<8x256xf32>
    %314 = arith.addf %313, %7 : vector<8x256xf32>
    %315 = math.tanh %314 : vector<8x256xf32>
    %316 = vector.extract_strided_slice %315 {offsets = [0, 0], sizes = [8, 64], strides = [1, 1]} : vector<8x256xf32> to vector<8x64xf32>
    %cst_99 = arith.constant 5.000000e-01 : f32
    %317 = vector.broadcast %cst_99 : f32 to vector<8x64xf32>
    %318 = arith.mulf %317, %316 : vector<8x64xf32>
    %cst_100 = arith.constant 5.000000e-01 : f32
    %319 = vector.broadcast %cst_100 : f32 to vector<8x64xf32>
    %320 = arith.addf %318, %319 : vector<8x64xf32>
    %321 = vector.extract_strided_slice %315 {offsets = [0, 64], sizes = [8, 64], strides = [1, 1]} : vector<8x256xf32> to vector<8x64xf32>
    %cst_101 = arith.constant 5.000000e-01 : f32
    %322 = vector.broadcast %cst_101 : f32 to vector<8x64xf32>
    %323 = arith.mulf %322, %321 : vector<8x64xf32>
    %cst_102 = arith.constant 5.000000e-01 : f32
    %324 = vector.broadcast %cst_102 : f32 to vector<8x64xf32>
    %325 = arith.addf %323, %324 : vector<8x64xf32>
    %326 = vector.extract_strided_slice %315 {offsets = [0, 128], sizes = [8, 64], strides = [1, 1]} : vector<8x256xf32> to vector<8x64xf32>
    %cst_103 = arith.constant 5.000000e-01 : f32
    %327 = vector.broadcast %cst_103 : f32 to vector<8x64xf32>
    %328 = arith.mulf %327, %326 : vector<8x64xf32>
    %cst_104 = arith.constant 5.000000e-01 : f32
    %329 = vector.broadcast %cst_104 : f32 to vector<8x64xf32>
    %330 = arith.addf %328, %329 : vector<8x64xf32>
    %331 = vector.extract_strided_slice %315 {offsets = [0, 192], sizes = [8, 64], strides = [1, 1]} : vector<8x256xf32> to vector<8x64xf32>
    %332 = arith.mulf %320, %310 : vector<8x64xf32>
    %333 = arith.mulf %325, %331 : vector<8x64xf32>
    %334 = arith.addf %332, %333 : vector<8x64xf32>
    %335 = math.tanh %334 : vector<8x64xf32>
    %336 = arith.mulf %330, %335 : vector<8x64xf32>
    %337 = vector.extract_strided_slice %336 {offsets = [0, 32], sizes = [8, 32], strides = [1, 1]} : vector<8x64xf32> to vector<8x32xf32>
    %338 = vector.broadcast %4 : vector<1x32xf32> to vector<8x32xf32>
    %339 = arith.mulf %337, %338 : vector<8x32xf32>
    %cst_105 = arith.constant dense<0.000000e+00> : vector<8xf32>
    %340 = vector.multi_reduction <add>, %339, %cst_105 [1] : vector<8x32xf32> to vector<8xf32>
    %341 = vector.shape_cast %340 : vector<8xf32> to vector<8x1xf32>
    %342 = vector.broadcast %5 : vector<1x1xf32> to vector<8x1xf32>
    %343 = arith.addf %341, %342 : vector<8x1xf32>
    %344 = vector.broadcast %343 : vector<8x1xf32> to vector<8x256xf32>
    %345 = vector.broadcast %1 : vector<1x256xf32> to vector<8x256xf32>
    %346 = arith.mulf %344, %345 : vector<8x256xf32>
    %347 = arith.addf %313, %346 : vector<8x256xf32>
    %348 = arith.addf %347, %7 : vector<8x256xf32>
    %349 = math.tanh %348 : vector<8x256xf32>
    %350 = vector.extract_strided_slice %349 {offsets = [0, 0], sizes = [8, 64], strides = [1, 1]} : vector<8x256xf32> to vector<8x64xf32>
    %cst_106 = arith.constant 5.000000e-01 : f32
    %351 = vector.broadcast %cst_106 : f32 to vector<8x64xf32>
    %352 = arith.mulf %351, %350 : vector<8x64xf32>
    %cst_107 = arith.constant 5.000000e-01 : f32
    %353 = vector.broadcast %cst_107 : f32 to vector<8x64xf32>
    %354 = arith.addf %352, %353 : vector<8x64xf32>
    %355 = vector.extract_strided_slice %349 {offsets = [0, 64], sizes = [8, 64], strides = [1, 1]} : vector<8x256xf32> to vector<8x64xf32>
    %cst_108 = arith.constant 5.000000e-01 : f32
    %356 = vector.broadcast %cst_108 : f32 to vector<8x64xf32>
    %357 = arith.mulf %356, %355 : vector<8x64xf32>
    %cst_109 = arith.constant 5.000000e-01 : f32
    %358 = vector.broadcast %cst_109 : f32 to vector<8x64xf32>
    %359 = arith.addf %357, %358 : vector<8x64xf32>
    %360 = vector.extract_strided_slice %349 {offsets = [0, 128], sizes = [8, 64], strides = [1, 1]} : vector<8x256xf32> to vector<8x64xf32>
    %cst_110 = arith.constant 5.000000e-01 : f32
    %361 = vector.broadcast %cst_110 : f32 to vector<8x64xf32>
    %362 = arith.mulf %361, %360 : vector<8x64xf32>
    %cst_111 = arith.constant 5.000000e-01 : f32
    %363 = vector.broadcast %cst_111 : f32 to vector<8x64xf32>
    %364 = arith.addf %362, %363 : vector<8x64xf32>
    %365 = vector.extract_strided_slice %349 {offsets = [0, 192], sizes = [8, 64], strides = [1, 1]} : vector<8x256xf32> to vector<8x64xf32>
    %366 = arith.mulf %354, %310 : vector<8x64xf32>
    %367 = arith.mulf %359, %365 : vector<8x64xf32>
    %368 = arith.addf %366, %367 : vector<8x64xf32>
    %369 = math.tanh %368 : vector<8x64xf32>
    %370 = arith.mulf %364, %369 : vector<8x64xf32>
    %cst_112 = arith.constant dense<0.000000e+00> : vector<8x256xf32>
    %371 = tpu.matmul %370, %0, %cst_112 {dimension_numbers = #tpu.dot_dimension_numbers<[1], [0], [0], [1], [0, 0, 1, 1], [], []>} : vector<8x64xf32>, vector<64x256xf32>, vector<8x256xf32> -> vector<8x256xf32>
    %372 = arith.addf %371, %7 : vector<8x256xf32>
    %373 = math.tanh %372 : vector<8x256xf32>
    %374 = vector.extract_strided_slice %373 {offsets = [0, 0], sizes = [8, 64], strides = [1, 1]} : vector<8x256xf32> to vector<8x64xf32>
    %cst_113 = arith.constant 5.000000e-01 : f32
    %375 = vector.broadcast %cst_113 : f32 to vector<8x64xf32>
    %376 = arith.mulf %375, %374 : vector<8x64xf32>
    %cst_114 = arith.constant 5.000000e-01 : f32
    %377 = vector.broadcast %cst_114 : f32 to vector<8x64xf32>
    %378 = arith.addf %376, %377 : vector<8x64xf32>
    %379 = vector.extract_strided_slice %373 {offsets = [0, 64], sizes = [8, 64], strides = [1, 1]} : vector<8x256xf32> to vector<8x64xf32>
    %cst_115 = arith.constant 5.000000e-01 : f32
    %380 = vector.broadcast %cst_115 : f32 to vector<8x64xf32>
    %381 = arith.mulf %380, %379 : vector<8x64xf32>
    %cst_116 = arith.constant 5.000000e-01 : f32
    %382 = vector.broadcast %cst_116 : f32 to vector<8x64xf32>
    %383 = arith.addf %381, %382 : vector<8x64xf32>
    %384 = vector.extract_strided_slice %373 {offsets = [0, 128], sizes = [8, 64], strides = [1, 1]} : vector<8x256xf32> to vector<8x64xf32>
    %cst_117 = arith.constant 5.000000e-01 : f32
    %385 = vector.broadcast %cst_117 : f32 to vector<8x64xf32>
    %386 = arith.mulf %385, %384 : vector<8x64xf32>
    %cst_118 = arith.constant 5.000000e-01 : f32
    %387 = vector.broadcast %cst_118 : f32 to vector<8x64xf32>
    %388 = arith.addf %386, %387 : vector<8x64xf32>
    %389 = vector.extract_strided_slice %373 {offsets = [0, 192], sizes = [8, 64], strides = [1, 1]} : vector<8x256xf32> to vector<8x64xf32>
    %390 = arith.mulf %378, %368 : vector<8x64xf32>
    %391 = arith.mulf %383, %389 : vector<8x64xf32>
    %392 = arith.addf %390, %391 : vector<8x64xf32>
    %393 = math.tanh %392 : vector<8x64xf32>
    %394 = arith.mulf %388, %393 : vector<8x64xf32>
    %395 = vector.extract_strided_slice %394 {offsets = [0, 32], sizes = [8, 32], strides = [1, 1]} : vector<8x64xf32> to vector<8x32xf32>
    %396 = vector.broadcast %4 : vector<1x32xf32> to vector<8x32xf32>
    %397 = arith.mulf %395, %396 : vector<8x32xf32>
    %cst_119 = arith.constant dense<0.000000e+00> : vector<8xf32>
    %398 = vector.multi_reduction <add>, %397, %cst_119 [1] : vector<8x32xf32> to vector<8xf32>
    %399 = vector.shape_cast %398 : vector<8xf32> to vector<8x1xf32>
    %400 = vector.broadcast %5 : vector<1x1xf32> to vector<8x1xf32>
    %401 = arith.addf %399, %400 : vector<8x1xf32>
    %402 = vector.broadcast %401 : vector<8x1xf32> to vector<8x256xf32>
    %403 = vector.broadcast %1 : vector<1x256xf32> to vector<8x256xf32>
    %404 = arith.mulf %402, %403 : vector<8x256xf32>
    %405 = arith.addf %371, %404 : vector<8x256xf32>
    %406 = arith.addf %405, %7 : vector<8x256xf32>
    %407 = math.tanh %406 : vector<8x256xf32>
    %408 = vector.extract_strided_slice %407 {offsets = [0, 0], sizes = [8, 64], strides = [1, 1]} : vector<8x256xf32> to vector<8x64xf32>
    %cst_120 = arith.constant 5.000000e-01 : f32
    %409 = vector.broadcast %cst_120 : f32 to vector<8x64xf32>
    %410 = arith.mulf %409, %408 : vector<8x64xf32>
    %cst_121 = arith.constant 5.000000e-01 : f32
    %411 = vector.broadcast %cst_121 : f32 to vector<8x64xf32>
    %412 = arith.addf %410, %411 : vector<8x64xf32>
    %413 = vector.extract_strided_slice %407 {offsets = [0, 64], sizes = [8, 64], strides = [1, 1]} : vector<8x256xf32> to vector<8x64xf32>
    %cst_122 = arith.constant 5.000000e-01 : f32
    %414 = vector.broadcast %cst_122 : f32 to vector<8x64xf32>
    %415 = arith.mulf %414, %413 : vector<8x64xf32>
    %cst_123 = arith.constant 5.000000e-01 : f32
    %416 = vector.broadcast %cst_123 : f32 to vector<8x64xf32>
    %417 = arith.addf %415, %416 : vector<8x64xf32>
    %418 = vector.extract_strided_slice %407 {offsets = [0, 128], sizes = [8, 64], strides = [1, 1]} : vector<8x256xf32> to vector<8x64xf32>
    %cst_124 = arith.constant 5.000000e-01 : f32
    %419 = vector.broadcast %cst_124 : f32 to vector<8x64xf32>
    %420 = arith.mulf %419, %418 : vector<8x64xf32>
    %cst_125 = arith.constant 5.000000e-01 : f32
    %421 = vector.broadcast %cst_125 : f32 to vector<8x64xf32>
    %422 = arith.addf %420, %421 : vector<8x64xf32>
    %423 = vector.extract_strided_slice %407 {offsets = [0, 192], sizes = [8, 64], strides = [1, 1]} : vector<8x256xf32> to vector<8x64xf32>
    %424 = arith.mulf %412, %368 : vector<8x64xf32>
    %425 = arith.mulf %417, %423 : vector<8x64xf32>
    %426 = arith.addf %424, %425 : vector<8x64xf32>
    %427 = math.tanh %426 : vector<8x64xf32>
    %428 = arith.mulf %422, %427 : vector<8x64xf32>
    %cst_126 = arith.constant dense<0.000000e+00> : vector<8x256xf32>
    %429 = tpu.matmul %428, %0, %cst_126 {dimension_numbers = #tpu.dot_dimension_numbers<[1], [0], [0], [1], [0, 0, 1, 1], [], []>} : vector<8x64xf32>, vector<64x256xf32>, vector<8x256xf32> -> vector<8x256xf32>
    %430 = arith.addf %429, %7 : vector<8x256xf32>
    %431 = math.tanh %430 : vector<8x256xf32>
    %432 = vector.extract_strided_slice %431 {offsets = [0, 0], sizes = [8, 64], strides = [1, 1]} : vector<8x256xf32> to vector<8x64xf32>
    %cst_127 = arith.constant 5.000000e-01 : f32
    %433 = vector.broadcast %cst_127 : f32 to vector<8x64xf32>
    %434 = arith.mulf %433, %432 : vector<8x64xf32>
    %cst_128 = arith.constant 5.000000e-01 : f32
    %435 = vector.broadcast %cst_128 : f32 to vector<8x64xf32>
    %436 = arith.addf %434, %435 : vector<8x64xf32>
    %437 = vector.extract_strided_slice %431 {offsets = [0, 64], sizes = [8, 64], strides = [1, 1]} : vector<8x256xf32> to vector<8x64xf32>
    %cst_129 = arith.constant 5.000000e-01 : f32
    %438 = vector.broadcast %cst_129 : f32 to vector<8x64xf32>
    %439 = arith.mulf %438, %437 : vector<8x64xf32>
    %cst_130 = arith.constant 5.000000e-01 : f32
    %440 = vector.broadcast %cst_130 : f32 to vector<8x64xf32>
    %441 = arith.addf %439, %440 : vector<8x64xf32>
    %442 = vector.extract_strided_slice %431 {offsets = [0, 128], sizes = [8, 64], strides = [1, 1]} : vector<8x256xf32> to vector<8x64xf32>
    %cst_131 = arith.constant 5.000000e-01 : f32
    %443 = vector.broadcast %cst_131 : f32 to vector<8x64xf32>
    %444 = arith.mulf %443, %442 : vector<8x64xf32>
    %cst_132 = arith.constant 5.000000e-01 : f32
    %445 = vector.broadcast %cst_132 : f32 to vector<8x64xf32>
    %446 = arith.addf %444, %445 : vector<8x64xf32>
    %447 = vector.extract_strided_slice %431 {offsets = [0, 192], sizes = [8, 64], strides = [1, 1]} : vector<8x256xf32> to vector<8x64xf32>
    %448 = arith.mulf %436, %426 : vector<8x64xf32>
    %449 = arith.mulf %441, %447 : vector<8x64xf32>
    %450 = arith.addf %448, %449 : vector<8x64xf32>
    %451 = math.tanh %450 : vector<8x64xf32>
    %452 = arith.mulf %446, %451 : vector<8x64xf32>
    %453 = vector.extract_strided_slice %452 {offsets = [0, 32], sizes = [8, 32], strides = [1, 1]} : vector<8x64xf32> to vector<8x32xf32>
    %454 = vector.broadcast %4 : vector<1x32xf32> to vector<8x32xf32>
    %455 = arith.mulf %453, %454 : vector<8x32xf32>
    %cst_133 = arith.constant dense<0.000000e+00> : vector<8xf32>
    %456 = vector.multi_reduction <add>, %455, %cst_133 [1] : vector<8x32xf32> to vector<8xf32>
    %457 = vector.shape_cast %456 : vector<8xf32> to vector<8x1xf32>
    %458 = vector.broadcast %5 : vector<1x1xf32> to vector<8x1xf32>
    %459 = arith.addf %457, %458 : vector<8x1xf32>
    %460 = tpu.concatenate %285, %343, %401, %459 in 1 : vector<8x1xf32>, vector<8x1xf32>, vector<8x1xf32>, vector<8x1xf32> -> vector<8x4xf32>
    %c0_134 = arith.constant 0 : index
    %c0_135 = arith.constant 0 : index
    %461 = vector.load %arg8[%c0_134, %c0_135] : memref<8x4xf32, #tpu.memory_space<vmem>>, vector<8x4xf32>
    tpu.vector_store %arg8[%c0_134, %c0_135], %460 {strides = array<i32>} : memref<8x4xf32, #tpu.memory_space<vmem>>, vector<8x4xf32>,
    return
  }
  func.func @transform_0(%arg0: i32) -> (i32, i32, i32) {
    %c0_i32 = arith.constant 0 : i32
    %c0_i32_0 = arith.constant 0 : i32
    %c0_i32_1 = arith.constant 0 : i32
    return %c0_i32, %arg0, %c0_i32_0 : i32, i32, i32
  }
  func.func @transform_1(%arg0: i32) -> (i32, i32) {
    %c0_i32 = arith.constant 0 : i32
    %c0_i32_0 = arith.constant 0 : i32
    %c0_i32_1 = arith.constant 0 : i32
    return %c0_i32, %c0_i32_0 : i32, i32
  }
  func.func @transform_2(%arg0: i32) -> (i32, i32) {
    %c0_i32 = arith.constant 0 : i32
    %c0_i32_0 = arith.constant 0 : i32
    %c0_i32_1 = arith.constant 0 : i32
    return %c0_i32, %c0_i32_0 : i32, i32
  }
  func.func @transform_3(%arg0: i32) -> (i32, i32) {
    %c0_i32 = arith.constant 0 : i32
    %c0_i32_0 = arith.constant 0 : i32
    %c0_i32_1 = arith.constant 0 : i32
    return %c0_i32, %c0_i32_0 : i32, i32
  }
  func.func @transform_4(%arg0: i32) -> (i32, i32) {
    %c0_i32 = arith.constant 0 : i32
    %c0_i32_0 = arith.constant 0 : i32
    %c0_i32_1 = arith.constant 0 : i32
    return %c0_i32, %c0_i32_0 : i32, i32
  }
  func.func @transform_5(%arg0: i32) -> (i32, i32) {
    %c0_i32 = arith.constant 0 : i32
    %c0_i32_0 = arith.constant 0 : i32
    %c0_i32_1 = arith.constant 0 : i32
    return %c0_i32, %c0_i32_0 : i32, i32
  }
  func.func @transform_6(%arg0: i32) -> (i32, i32) {
    %c0_i32 = arith.constant 0 : i32
    %c0_i32_0 = arith.constant 0 : i32
    %c0_i32_1 = arith.constant 0 : i32
    return %c0_i32, %c0_i32_0 : i32, i32
  }
  func.func @transform_7(%arg0: i32) -> (i32, i32) {
    %c0_i32 = arith.constant 0 : i32
    %c0_i32_0 = arith.constant 0 : i32
    return %arg0, %c0_i32 : i32, i32
  }
}

</mosaic_0001>

<bundles_post_ra>
// kernel: tpu_custom_call.1
= control target key start
LH: loop header
LB: loop body
LE: loop exit
PB: predicated region body
PF: predicated region fallthrough
CT: control target
= control target key end

     0   :  { %s1567_s0 = inlined_call_operand.vmem [shape: f32[8,8,1], index: 0, kind: input, shape index: {}]   ;;  %s1568_s1 = inlined_call_operand.hbm [shape: f32[64,256], index: 1, kind: input, shape index: {}]   ;;  %s1569_s2 = inlined_call_operand.vmem [shape: f32[1,256], index: 2, kind: input, shape index: {}]   ;;  %s1570_s3 = inlined_call_operand.vmem [shape: f32[1,256], index: 3, kind: input, shape index: {}]   ;;  %s1571_s4 = inlined_call_operand.vmem [shape: f32[1,256], index: 4, kind: input, shape index: {}]   ;;  %s1572_s5 = inlined_call_operand.vmem [shape: f32[1,32], index: 5, kind: input, shape index: {}]   ;;  %s1573_s6 = inlined_call_operand.<no memory space> [shape: f32[1,1], index: 6, kind: input, shape index: {}]   ;;  %s1574_s7 = inlined_call_operand.vmem [shape: f32[8,4], index: 7, kind: output, shape index: {}]  }
   0x1   :  { %v12_v0 = vstv %s1573_s6 }
   0x2   :  { %13 = vst [vmem:[#allocation2] sm:$0x1] %v12_v0 }
   0x3   :  { %14 = vsyncpa [#allocation4], 0  ;;  %s21_s28 = sshll.u32 %s1568_s1, 4  ;;  %s1133_s29 = smov [#allocation3]   ;;  %s22_s28 = int_to_ptr.hbm [resolvable:$true] %s21_s28 }
   0x4   :  { %s23_s30 = sshll.u32 %s1133_s29, 4  ;;  %s1134_s8 = smov 256   ;;  %s24_s30 = int_to_ptr.vmem [resolvable:$true] %s23_s30 }
   0x5   :  { %s1135_s9 = smov 16  }
   0x6   :  { %29 = dma.hbm_to_vmem [thread:$0]  %s22_s28, 2048, %s24_s30, [#allocation4], %s1134_s8, %s1134_s8, %s1135_s9  }
   0x7   :  { %1131 = dma.done.wait [#allocation4], 2048  }
   0x8   :  { %1132 = vsyncadd [#allocation4], 4294965248  ;;  %v1136_v1 = vmov 0   ;;  %v70_v2 = vld [vmem:[%s1567_s0] sm:$0xff]  ;;  %v1195_v4 = vld [vmem:[#allocation3 + $0x70] sm:$0xff]  ;;  %vm114_vm0 = vcmask 523264  }
   0x9   :  { %1012 = vset.pattern.permute.xlu0 %v1136_v1  ;;  %1013 = vset.pattern.permute.xlu1 %v1136_v1  ;;  %v60_v3 = vld [vmem:[%s1569_s2] sm:$0x3]  ;;  %v1203_v7 = vld [vmem:[#allocation3 + $0x68] sm:$0xff]  ;;  %s1137_s2 = smov 64   ;;  %v979_v23 = vld [vmem:[%s1567_s0 + $0x18] sm:$0xff]  ;;  %s1138_s29 = smov 32  }
   0xa   :  { %1014 = vset.pattern.permute.xlu2 %v1136_v1  ;;  %73 = vperm.xlu0 %1012, %v70_v2   ;;  %v1197_v5 = vld [vmem:[#allocation3 + $0x78] sm:$0xff]  ;;  %v1199_v6 = vld [vmem:[#allocation3 + $0x60] sm:$0xff]  ;;  %v1210_v9 = vperm.slane %v60_v3, 0  ;;  %v1212_v10 = vperm.slane %v60_v3, 1  ;;  %v1230_v24 = vld [vmem:[#allocation3 + $0x50] sm:$0xff]  ;;  %vm659_vm1 = vcmask 261120  }
   0xb   :  { %126 = vmatpush.msra.mxu0 %v1195_v4  ;;  %146 = vmatpush.msra.mxu1 %v1197_v5  ;;  %v61_v8 = vld [vmem:[%s1570_s3] sm:$0x3]  ;;  %v1238_v27 = vld [vmem:[#allocation3 + $0x48] sm:$0xff]  ;;  %v1240_v28 = vld [vmem:[#allocation3 + $0x30] sm:$0xff]  ;;  %s1140_s30 = smov 2   ;;  %s1141_s8 = smov 1  }
   0xc   :  { %195 = vmatpush.msra.mxu2 %v1195_v4  ;;  %215 = vmatpush.msra.mxu3 %v1197_v5  ;;  %v84_v11 = vperm.slane %v61_v8, 0  ;;  %v85_v15 = vperm.slane %v61_v8, 1  ;;  %v1232_v25 = vld [vmem:[#allocation3 + $0x58] sm:$0xff]  ;;  %v1236_v26 = vld [vmem:[#allocation3 + $0x40] sm:$0xff]  ;;  %v1250_v31 = vld [vmem:[#allocation3 + $0x28] sm:$0xff]  ;;  %s1142_s9 = smov 3  }
   0xd   :  { %127 = vmatpush.msra.mxu0 %v1199_v6  ;;  %147 = vmatpush.msra.mxu1 %v1203_v7  ;;  %v1246_v29 = vld [vmem:[#allocation3 + $0x38] sm:$0xff]  ;;  %v1248_v30 = vld [vmem:[#allocation3 + $0x20] sm:$0xff]  ;;  %v1260_v32 = vld [vmem:[#allocation3 + $0x10] sm:$0xff]  ;;  %vm960_vm2 = vcmask 7168   ;;  %vm962_vm3 = vcmask 15360   ;;  %vm964_vm4 = vcmask 23552  }
   0xe   :  { %196 = vmatpush.msra.mxu2 %v1199_v6  ;;  %216 = vmatpush.msra.mxu3 %v1203_v7  ;;  %v1262_v33 = vld [vmem:[#allocation3 + $0x18] sm:$0xff]  ;;  %v1264_v34 = vld [vmem:[#allocation3] sm:$0xff]  ;;  %v1270_v35 = vld [vmem:[#allocation3 + $0x8] sm:$0xff]  ;;  %vm966_vm5 = vcmask 31744  }
   0xf   :  { %128 = vmatpush.msra.mxu0 %v1230_v24  ;;  %148 = vmatpush.msra.mxu1 %v1232_v25  ;;  %v973_v36 = vld [vmem:[%s1567_s0 + $0x8] sm:$0xff]  ;;  %v62_v45 = vld [vmem:[%s1571_s4] sm:$0x3]  ;;  %v976_v61 = vld [vmem:[%s1567_s0 + $0x10] sm:$0xff] }
  0x10   :  { %197 = vmatpush.msra.mxu2 %v1230_v24  ;;  %217 = vmatpush.msra.mxu3 %v1232_v25  ;;  %v1338_v48 = vperm.slane %v62_v45, 0  ;;  %v1340_v52 = vperm.slane %v62_v45, 1 }
  0x11   :  { %129 = vmatpush.msra.mxu0 %v1236_v26  ;;  %149 = vmatpush.msra.mxu1 %v1238_v27 }
  0x12   :  { %198 = vmatpush.msra.mxu2 %v1236_v26  ;;  %218 = vmatpush.msra.mxu3 %v1238_v27 }
  0x13   :  { %130 = vmatpush.msra.mxu0 %v1240_v28  ;;  %150 = vmatpush.msra.mxu1 %v1246_v29 }
  0x14   :  { %199 = vmatpush.msra.mxu2 %v1240_v28  ;;  %219 = vmatpush.msra.mxu3 %v1246_v29 }
  0x15   :  { %131 = vmatpush.msra.mxu0 %v1248_v30  ;;  %151 = vmatpush.msra.mxu1 %v1250_v31 }
  0x16   :  { %200 = vmatpush.msra.mxu2 %v1248_v30  ;;  %220 = vmatpush.msra.mxu3 %v1250_v31 }
  0x17   :  { %132 = vmatpush.msra.mxu0 %v1260_v32  ;;  %152 = vmatpush.msra.mxu1 %v1262_v33 }
  0x18   :  { %201 = vmatpush.msra.mxu2 %v1260_v32  ;;  %221 = vmatpush.msra.mxu3 %v1262_v33 }
  0x19   :  { %133 = vmatpush.msra.mxu0 %v1264_v34  ;;  %153 = vmatpush.msra.mxu1 %v1270_v35 }
  0x1a   :  { %109 = vperm.xlu1 %1013, %v973_v36   ;;  %202 = vmatpush.msra.mxu2 %v1264_v34 }
  0x1b   :  { %222 = vmatpush.msra.mxu3 %v1270_v35  ;;  %264 = vmatpush.msrb.mxu0 %v1195_v4 }
  0x1c   :  { %284 = vmatpush.msrb.mxu1 %v1197_v5  ;;  %333 = vmatpush.msrb.mxu2 %v1195_v4 }
  0x1d   :  { %265 = vmatpush.msrb.mxu0 %v1199_v6  ;;  %353 = vmatpush.msrb.mxu3 %v1197_v5 }
  0x1e   :  { %285 = vmatpush.msrb.mxu1 %v1203_v7  ;;  %334 = vmatpush.msrb.mxu2 %v1199_v6 }
  0x1f   :  { %266 = vmatpush.msrb.mxu0 %v1230_v24  ;;  %354 = vmatpush.msrb.mxu3 %v1203_v7 }
  0x20   :  { %286 = vmatpush.msrb.mxu1 %v1232_v25  ;;  %335 = vmatpush.msrb.mxu2 %v1230_v24 }
  0x21   :  { %267 = vmatpush.msrb.mxu0 %v1236_v26  ;;  %355 = vmatpush.msrb.mxu3 %v1232_v25 }
  0x22   :  { %287 = vmatpush.msrb.mxu1 %v1238_v27  ;;  %336 = vmatpush.msrb.mxu2 %v1236_v26 }
  0x23   :  { %268 = vmatpush.msrb.mxu0 %v1240_v28  ;;  %356 = vmatpush.msrb.mxu3 %v1238_v27 }
  0x24   :  { %288 = vmatpush.msrb.mxu1 %v1246_v29  ;;  %337 = vmatpush.msrb.mxu2 %v1240_v28 }
  0x25   :  { %269 = vmatpush.msrb.mxu0 %v1248_v30  ;;  %357 = vmatpush.msrb.mxu3 %v1246_v29 }
  0x26   :  { %289 = vmatpush.msrb.mxu1 %v1250_v31  ;;  %338 = vmatpush.msrb.mxu2 %v1248_v30 }
  0x27   :  { %270 = vmatpush.msrb.mxu0 %v1260_v32  ;;  %358 = vmatpush.msrb.mxu3 %v1250_v31 }
  0x28   :  { %290 = vmatpush.msrb.mxu1 %v1262_v33  ;;  %339 = vmatpush.msrb.mxu2 %v1260_v32 }
  0x29   :  { %271 = vmatpush.msrb.mxu0 %v1264_v34  ;;  %359 = vmatpush.msrb.mxu3 %v1262_v33 }
  0x2a   :  { %291 = vmatpush.msrb.mxu1 %v1270_v35  ;;  %340 = vmatpush.msrb.mxu2 %v1264_v34 }
  0x2b   :  { %360 = vmatpush.msrb.mxu3 %v1270_v35  ;;  %179 = vperm.xlu2 %1014, %v976_v61   ;;  %v985_v61 = vld [vmem:[%s1567_s0 + $0x28] sm:$0xff] }
  0x7c   :  { %v74_v12 = vpop.permute.xlu0 %73 }
  0x7d   :  { %v81_v13 = vmul.f32 %v1210_v9, %v74_v12  ;;  %v82_v14 = vmul.f32 %v1212_v10, %v74_v12 }
  0x7f   :  { %v88_v16 = vadd.f32 %v84_v11, %v81_v13  ;;  %v89_v17 = vadd.f32 %v85_v15, %v82_v14 }
  0x81   :  { %1017 = vtanh.f32 %v88_v16 }
  0x82   :  { %1019 = vtanh.f32 %v89_v17 }
  0x85   :  { %v180_v11 = vpop.permute.xlu2 %179 }
  0x86   :  { %v182_v12 = vmul.f32 %v180_v11, %v1210_v9  ;;  %v183_v13 = vmul.f32 %v180_v11, %v1212_v10 }
  0x87   :  { %v1018_v18 = vpop.eup %1017 }
  0x88   :  { %v92_v19 = vmul.f32 0.5, %v1018_v18  ;;  %v1222_v21 = vpop.eup %1019 }
  0x89   :  { %v94_v40 = vmul.f32 0.5, %v1222_v21 }
  0x8a   :  { %v1220_v20 = vadd.f32 0.5, %v92_v19 }
  0x8b   :  { %v95_v41 = vadd.f32 0.5, %v94_v40 }
  0x8c   :  { %v97_v22 = vmul.f32 %v1222_v21, %v1220_v20  ;;  %v96_v37 = vmul.f32 0.0, %v1220_v20  ;;  %v110_v44 = vpop.permute.xlu1 %109 }
  0x8d   :  { %v112_v46 = vmul.f32 %v110_v44, %v1210_v9  ;;  %v113_v47 = vmul.f32 %v110_v44, %v1212_v10 }
  0x8e   :  { %99 = vrot.lane.b32.xlu0 %v97_v22, %s1137_s2 }
  0x96   :  { %248 = vperm.xlu0 %1012, %v979_v23  }
 0x100   :  { %v100_v38 = vpop.permute.xlu0 %99 }
 0x101   :  { %v102_v39 = vadd.f32 %v100_v38, %v96_v37  ;;  %v982_v37 = vld [vmem:[%s1567_s0 + $0x20] sm:$0xff] }
 0x103   :  { %1021 = vtanh.f32 %v102_v39 }
 0x108   :  { %v249_v45 = vpop.permute.xlu0 %248 }
 0x109   :  { %v1022_v42 = vpop.eup %1021 }
 0x10a   :  { %v104_v43 = vmul.f32 %v1022_v42, %v95_v41 }
 0x10c   :  { %974 = vmatmul.msk.f32.vlgmr.msra.gmra.mxu0 %vm114_vm0, %v104_v43  ;;  %975 = vmatmul.msk.f32.vlgmr.msra.gmra.mxu1 %vm114_vm0, %v104_v43 }
 0x10d   :  { %402 = vmatpush.msra.mxu0 %v1195_v4  ;;  %422 = vmatpush.msra.mxu1 %v1197_v5 }
 0x10f   :  { %403 = vmatpush.msra.mxu0 %v1199_v6  ;;  %423 = vmatpush.msra.mxu1 %v1203_v7 }
 0x111   :  { %404 = vmatpush.msra.mxu0 %v1230_v24  ;;  %424 = vmatpush.msra.mxu1 %v1232_v25 }
 0x113   :  { %405 = vmatpush.msra.mxu0 %v1236_v26  ;;  %425 = vmatpush.msra.mxu1 %v1238_v27 }
 0x115   :  { %406 = vmatpush.msra.mxu0 %v1240_v28  ;;  %426 = vmatpush.msra.mxu1 %v1246_v29 }
 0x117   :  { %407 = vmatpush.msra.mxu0 %v1248_v30  ;;  %427 = vmatpush.msra.mxu1 %v1250_v31 }
 0x119   :  { %408 = vmatpush.msra.mxu0 %v1260_v32  ;;  %428 = vmatpush.msra.mxu1 %v1262_v33 }
 0x11b   :  { %409 = vmatpush.msra.mxu0 %v1264_v34  ;;  %429 = vmatpush.msra.mxu1 %v1270_v35 }
 0x189   :  { %v135_v49 = vpop.f32.mrf.mxu0  ;;  %v155_v50 = vpop.f32.mrf.mxu1 }
 0x18a   :  { %v136_v51 = vadd.f32 %v135_v49, %v112_v46  ;;  %v156_v53 = vadd.f32 %v155_v50, %v113_v47  ;;  %v251_v46 = vmul.f32 %v249_v45, %v1210_v9  ;;  %v252_v47 = vmul.f32 %v249_v45, %v1212_v10 }
 0x18c   :  { %v158_v54 = vadd.f32 %v136_v51, %v1338_v48  ;;  %v159_v55 = vadd.f32 %v156_v53, %v1340_v52 }
 0x18e   :  { %1023 = vtanh.f32 %v158_v54 }
 0x18f   :  { %1025 = vtanh.f32 %v159_v55 }
 0x194   :  { %v1024_v56 = vpop.eup %1023 }
 0x195   :  { %v162_v57 = vmul.f32 0.5, %v1024_v56  ;;  %v1026_v59 = vpop.eup %1025 }
 0x196   :  { %v164_v1 = vmul.f32 0.5, %v1026_v59 }
 0x197   :  { %v163_v58 = vadd.f32 0.5, %v162_v57 }
 0x198   :  { %v165_v2 = vadd.f32 0.5, %v164_v1 }
 0x199   :  { %v167_v60 = vmul.f32 %v1026_v59, %v163_v58  ;;  %v166_v62 = vmul.f32 %v163_v58, %v102_v39 }
 0x19b   :  { %169 = vrot.lane.b32.xlu1 %v167_v60, %s1137_s2 }
 0x20d   :  { %v170_v63 = vpop.permute.xlu1 %169 }
 0x20e   :  { %v172_v0 = vadd.f32 %v170_v63, %v166_v62 }
 0x210   :  { %1027 = vtanh.f32 %v172_v0 }
 0x216   :  { %v1028_v3 = vpop.eup %1027 }
 0x217   :  { %v174_v8 = vmul.f32 %v1028_v3, %v165_v2 }
 0x219   :  { %977 = vmatmul.msk.f32.vlgmr.msra.gmra.mxu2 %vm114_vm0, %v174_v8  ;;  %978 = vmatmul.msk.f32.vlgmr.msra.gmra.mxu3 %vm114_vm0, %v174_v8 }
 0x21a   :  { %471 = vmatpush.msra.mxu2 %v1195_v4  ;;  %491 = vmatpush.msra.mxu3 %v1197_v5 }
 0x21c   :  { %472 = vmatpush.msra.mxu2 %v1199_v6  ;;  %492 = vmatpush.msra.mxu3 %v1203_v7 }
 0x21e   :  { %473 = vmatpush.msra.mxu2 %v1230_v24  ;;  %493 = vmatpush.msra.mxu3 %v1232_v25 }
 0x220   :  { %474 = vmatpush.msra.mxu2 %v1236_v26  ;;  %494 = vmatpush.msra.mxu3 %v1238_v27 }
 0x222   :  { %475 = vmatpush.msra.mxu2 %v1240_v28  ;;  %495 = vmatpush.msra.mxu3 %v1246_v29 }
 0x224   :  { %476 = vmatpush.msra.mxu2 %v1248_v30  ;;  %496 = vmatpush.msra.mxu3 %v1250_v31 }
 0x226   :  { %477 = vmatpush.msra.mxu2 %v1260_v32  ;;  %497 = vmatpush.msra.mxu3 %v1262_v33 }
 0x228   :  { %478 = vmatpush.msra.mxu2 %v1264_v34  ;;  %498 = vmatpush.msra.mxu3 %v1270_v35 }
 0x29c   :  { %v204_v14 = vpop.f32.mrf.mxu2  ;;  %v224_v15 = vpop.f32.mrf.mxu3 }
 0x29d   :  { %v205_v16 = vadd.f32 %v204_v14, %v182_v12  ;;  %v225_v17 = vadd.f32 %v224_v15, %v183_v13 }
 0x29f   :  { %v227_v18 = vadd.f32 %v205_v16, %v1338_v48  ;;  %v228_v19 = vadd.f32 %v225_v17, %v1340_v52 }
 0x2a1   :  { %1029 = vtanh.f32 %v227_v18 }
 0x2a2   :  { %1031 = vtanh.f32 %v228_v19 }
 0x2a7   :  { %v1030_v20 = vpop.eup %1029 }
 0x2a8   :  { %v231_v21 = vmul.f32 0.5, %v1030_v20  ;;  %v1032_v23 = vpop.eup %1031 }
 0x2a9   :  { %v233_v41 = vmul.f32 0.5, %v1032_v23 }
 0x2aa   :  { %v232_v22 = vadd.f32 0.5, %v231_v21 }
 0x2ab   :  { %v234_v42 = vadd.f32 0.5, %v233_v41 }
 0x2ac   :  { %v236_v36 = vmul.f32 %v1032_v23, %v232_v22  ;;  %v235_v38 = vmul.f32 %v232_v22, %v172_v0 }
 0x2ae   :  { %238 = vrot.lane.b32.xlu2 %v236_v36, %s1137_s2 }
 0x2b6   :  { %317 = vperm.xlu2 %1014, %v982_v37   ;;  %v988_v37 = vld [vmem:[%s1567_s0 + $0x30] sm:$0xff] }
 0x308   :  { %v239_v39 = vpop.permute.xlu2 %238 }
 0x309   :  { %v241_v40 = vadd.f32 %v239_v39, %v235_v38 }
 0x30b   :  { %1033 = vtanh.f32 %v241_v40 }
 0x310   :  { %v318_v11 = vpop.permute.xlu2 %317 }
 0x311   :  { %v1034_v43 = vpop.eup %1033  ;;  %v320_v12 = vmul.f32 %v318_v11, %v1210_v9  ;;  %v321_v13 = vmul.f32 %v318_v11, %v1212_v10 }
 0x312   :  { %v243_v44 = vmul.f32 %v1034_v43, %v234_v42 }
 0x314   :  { %980 = vmatmul.msk.f32.vlgmr.msrb.gmra.mxu0 %vm114_vm0, %v243_v44  ;;  %981 = vmatmul.msk.f32.vlgmr.msrb.gmra.mxu1 %vm114_vm0, %v243_v44 }
 0x315   :  { %540 = vmatpush.msrb.mxu0 %v1195_v4  ;;  %560 = vmatpush.msrb.mxu1 %v1197_v5 }
 0x317   :  { %541 = vmatpush.msrb.mxu0 %v1199_v6  ;;  %561 = vmatpush.msrb.mxu1 %v1203_v7 }
 0x319   :  { %542 = vmatpush.msrb.mxu0 %v1230_v24  ;;  %562 = vmatpush.msrb.mxu1 %v1232_v25 }
 0x31b   :  { %543 = vmatpush.msrb.mxu0 %v1236_v26  ;;  %563 = vmatpush.msrb.mxu1 %v1238_v27 }
 0x31d   :  { %544 = vmatpush.msrb.mxu0 %v1240_v28  ;;  %564 = vmatpush.msrb.mxu1 %v1246_v29 }
 0x31f   :  { %545 = vmatpush.msrb.mxu0 %v1248_v30  ;;  %565 = vmatpush.msrb.mxu1 %v1250_v31 }
 0x321   :  { %546 = vmatpush.msrb.mxu0 %v1260_v32  ;;  %566 = vmatpush.msrb.mxu1 %v1262_v33 }
 0x323   :  { %547 = vmatpush.msrb.mxu0 %v1264_v34  ;;  %567 = vmatpush.msrb.mxu1 %v1270_v35 }
 0x391   :  { %v273_v49 = vpop.f32.mrf.mxu0  ;;  %v293_v50 = vpop.f32.mrf.mxu1 }
 0x392   :  { %v274_v51 = vadd.f32 %v273_v49, %v251_v46  ;;  %v294_v53 = vadd.f32 %v293_v50, %v252_v47 }
 0x394   :  { %v296_v54 = vadd.f32 %v274_v51, %v1338_v48  ;;  %v297_v55 = vadd.f32 %v294_v53, %v1340_v52 }
 0x396   :  { %1035 = vtanh.f32 %v296_v54 }
 0x397   :  { %1037 = vtanh.f32 %v297_v55 }
 0x39c   :  { %v1036_v56 = vpop.eup %1035 }
 0x39d   :  { %v300_v57 = vmul.f32 0.5, %v1036_v56  ;;  %v1038_v59 = vpop.eup %1037 }
 0x39e   :  { %v302_v1 = vmul.f32 0.5, %v1038_v59 }
 0x39f   :  { %v301_v58 = vadd.f32 0.5, %v300_v57 }
 0x3a0   :  { %v303_v2 = vadd.f32 0.5, %v302_v1 }
 0x3a1   :  { %v305_v60 = vmul.f32 %v1038_v59, %v301_v58  ;;  %v304_v62 = vmul.f32 %v301_v58, %v241_v40 }
 0x3a3   :  { %307 = vrot.lane.b32.xlu1 %v305_v60, %s1137_s2 }
 0x3ab   :  { %386 = vperm.xlu1 %1013, %v985_v61   ;;  %v991_v61 = vld [vmem:[%s1567_s0 + $0x38] sm:$0xff] }
 0x415   :  { %v308_v63 = vpop.permute.xlu1 %307 }
 0x416   :  { %v310_v0 = vadd.f32 %v308_v63, %v304_v62 }
 0x418   :  { %1039 = vtanh.f32 %v310_v0 }
 0x41d   :  { %v387_v45 = vpop.permute.xlu1 %386 }
 0x41e   :  { %v1040_v3 = vpop.eup %1039  ;;  %v389_v46 = vmul.f32 %v387_v45, %v1210_v9  ;;  %v390_v47 = vmul.f32 %v387_v45, %v1212_v10 }
 0x41f   :  { %v312_v8 = vmul.f32 %v1040_v3, %v303_v2 }
 0x421   :  { %983 = vmatmul.msk.f32.vlgmr.msrb.gmra.mxu2 %vm114_vm0, %v312_v8  ;;  %984 = vmatmul.msk.f32.vlgmr.msrb.gmra.mxu3 %vm114_vm0, %v312_v8 }
 0x422   :  { %600 = vmatpush.msrb.mxu2 %v1195_v4  ;;  %620 = vmatpush.msrb.mxu3 %v1197_v5 }
 0x424   :  { %601 = vmatpush.msrb.mxu2 %v1199_v6  ;;  %621 = vmatpush.msrb.mxu3 %v1203_v7 }
 0x426   :  { %602 = vmatpush.msrb.mxu2 %v1230_v24  ;;  %622 = vmatpush.msrb.mxu3 %v1232_v25 }
 0x428   :  { %603 = vmatpush.msrb.mxu2 %v1236_v26  ;;  %623 = vmatpush.msrb.mxu3 %v1238_v27 }
 0x42a   :  { %604 = vmatpush.msrb.mxu2 %v1240_v28  ;;  %624 = vmatpush.msrb.mxu3 %v1246_v29 }
 0x42c   :  { %605 = vmatpush.msrb.mxu2 %v1248_v30  ;;  %625 = vmatpush.msrb.mxu3 %v1250_v31 }
 0x42e   :  { %606 = vmatpush.msrb.mxu2 %v1260_v32  ;;  %626 = vmatpush.msrb.mxu3 %v1262_v33 }
 0x430   :  { %607 = vmatpush.msrb.mxu2 %v1264_v34  ;;  %627 = vmatpush.msrb.mxu3 %v1270_v35 }
 0x4a4   :  { %v342_v14 = vpop.f32.mrf.mxu2  ;;  %v362_v15 = vpop.f32.mrf.mxu3 }
 0x4a5   :  { %v343_v16 = vadd.f32 %v342_v14, %v320_v12  ;;  %v363_v17 = vadd.f32 %v362_v15, %v321_v13 }
 0x4a7   :  { %v365_v18 = vadd.f32 %v343_v16, %v1338_v48  ;;  %v366_v19 = vadd.f32 %v363_v17, %v1340_v52 }
 0x4a9   :  { %1041 = vtanh.f32 %v365_v18 }
 0x4aa   :  { %1043 = vtanh.f32 %v366_v19 }
 0x4af   :  { %v1042_v20 = vpop.eup %1041 }
 0x4b0   :  { %v369_v21 = vmul.f32 0.5, %v1042_v20  ;;  %v1044_v23 = vpop.eup %1043 }
 0x4b1   :  { %v371_v41 = vmul.f32 0.5, %v1044_v23 }
 0x4b2   :  { %v370_v22 = vadd.f32 0.5, %v369_v21 }
 0x4b3   :  { %v372_v42 = vadd.f32 0.5, %v371_v41 }
 0x4b4   :  { %v374_v36 = vmul.f32 %v1044_v23, %v370_v22  ;;  %v373_v38 = vmul.f32 %v370_v22, %v310_v0 }
 0x4b6   :  { %376 = vrot.lane.b32.xlu0 %v374_v36, %s1137_s2 }
 0x4be   :  { %455 = vperm.xlu0 %1012, %v988_v37  }
 0x528   :  { %v377_v39 = vpop.permute.xlu0 %376 }
 0x529   :  { %v379_v40 = vadd.f32 %v377_v39, %v373_v38 }
 0x52b   :  { %1045 = vtanh.f32 %v379_v40 }
 0x530   :  { %v456_v11 = vpop.permute.xlu0 %455 }
 0x531   :  { %v1046_v43 = vpop.eup %1045  ;;  %v458_v12 = vmul.f32 %v456_v11, %v1210_v9  ;;  %v459_v13 = vmul.f32 %v456_v11, %v1212_v10 }
 0x532   :  { %v381_v44 = vmul.f32 %v1046_v43, %v372_v42 }
 0x534   :  { %986 = vmatmul.msk.f32.vlgmr.msra.gmra.mxu0 %vm114_vm0, %v381_v44  ;;  %987 = vmatmul.msk.f32.vlgmr.msra.gmra.mxu1 %vm114_vm0, %v381_v44 }
 0x535   :  { %704 = vmatpush.msra.mxu0 %v1195_v4  ;;  %724 = vmatpush.msra.mxu1 %v1197_v5 }
 0x537   :  { %705 = vmatpush.msra.mxu0 %v1199_v6  ;;  %725 = vmatpush.msra.mxu1 %v1203_v7 }
 0x539   :  { %706 = vmatpush.msra.mxu0 %v1230_v24  ;;  %726 = vmatpush.msra.mxu1 %v1232_v25 }
 0x53b   :  { %707 = vmatpush.msra.mxu0 %v1236_v26  ;;  %727 = vmatpush.msra.mxu1 %v1238_v27 }
 0x53d   :  { %708 = vmatpush.msra.mxu0 %v1240_v28  ;;  %728 = vmatpush.msra.mxu1 %v1246_v29 }
 0x53f   :  { %709 = vmatpush.msra.mxu0 %v1248_v30  ;;  %729 = vmatpush.msra.mxu1 %v1250_v31 }
 0x541   :  { %710 = vmatpush.msra.mxu0 %v1260_v32  ;;  %730 = vmatpush.msra.mxu1 %v1262_v33 }
 0x543   :  { %711 = vmatpush.msra.mxu0 %v1264_v34  ;;  %731 = vmatpush.msra.mxu1 %v1270_v35 }
 0x5b1   :  { %v411_v49 = vpop.f32.mrf.mxu0  ;;  %v431_v50 = vpop.f32.mrf.mxu1 }
 0x5b2   :  { %v412_v51 = vadd.f32 %v411_v49, %v389_v46  ;;  %v432_v53 = vadd.f32 %v431_v50, %v390_v47  ;;  %v1015_v50 = vld [vmem:[%s1572_s5] ss:$0 sm:$0xff]  ;;  %s1139_s5 = smov 96  }
 0x5b4   :  { %v434_v54 = vadd.f32 %v412_v51, %v1338_v48  ;;  %v435_v55 = vadd.f32 %v432_v53, %v1340_v52 }
 0x5b6   :  { %1047 = vtanh.f32 %v434_v54 }
 0x5b7   :  { %1049 = vtanh.f32 %v435_v55 }
 0x5bc   :  { %v1048_v56 = vpop.eup %1047 }
 0x5bd   :  { %v438_v57 = vmul.f32 0.5, %v1048_v56  ;;  %v1050_v59 = vpop.eup %1049 }
 0x5be   :  { %v440_v1 = vmul.f32 0.5, %v1050_v59 }
 0x5bf   :  { %v439_v58 = vadd.f32 0.5, %v438_v57 }
 0x5c0   :  { %v441_v2 = vadd.f32 0.5, %v440_v1 }
 0x5c1   :  { %v443_v60 = vmul.f32 %v1050_v59, %v439_v58  ;;  %v442_v62 = vmul.f32 %v439_v58, %v379_v40 }
 0x5c3   :  { %445 = vrot.lane.b32.xlu2 %v443_v60, %s1137_s2 }
 0x5cb   :  { %524 = vperm.xlu2 %1014, %v991_v61  }
 0x5d3   :  { %651 = vrot.lane.b32.xlu2 %v1015_v50, %s1138_s29 }
 0x61d   :  { %v446_v63 = vpop.permute.xlu2 %445 }
 0x61e   :  { %v448_v0 = vadd.f32 %v446_v63, %v442_v62 }
 0x620   :  { %1051 = vtanh.f32 %v448_v0 }
 0x626   :  { %v1052_v3 = vpop.eup %1051 }
 0x627   :  { %v450_v8 = vmul.f32 %v1052_v3, %v441_v2 }
 0x629   :  { %989 = vmatmul.msk.f32.vlgmr.msra.gmra.mxu2 %vm114_vm0, %v450_v8  ;;  %990 = vmatmul.msk.f32.vlgmr.msra.gmra.mxu3 %vm114_vm0, %v450_v8 }
 0x62a   :  { %799 = vmatpush.msra.mxu2 %v1195_v4  ;;  %819 = vmatpush.msra.mxu3 %v1197_v5 }
 0x62c   :  { %800 = vmatpush.msra.mxu2 %v1199_v6  ;;  %820 = vmatpush.msra.mxu3 %v1203_v7 }
 0x62e   :  { %801 = vmatpush.msra.mxu2 %v1230_v24  ;;  %821 = vmatpush.msra.mxu3 %v1232_v25 }
 0x630   :  { %802 = vmatpush.msra.mxu2 %v1236_v26  ;;  %822 = vmatpush.msra.mxu3 %v1238_v27 }
 0x632   :  { %803 = vmatpush.msra.mxu2 %v1240_v28  ;;  %823 = vmatpush.msra.mxu3 %v1246_v29 }
 0x634   :  { %804 = vmatpush.msra.mxu2 %v1248_v30  ;;  %824 = vmatpush.msra.mxu3 %v1250_v31 }
 0x636   :  { %805 = vmatpush.msra.mxu2 %v1260_v32  ;;  %825 = vmatpush.msra.mxu3 %v1262_v33 }
 0x638   :  { %806 = vmatpush.msra.mxu2 %v1264_v34  ;;  %826 = vmatpush.msra.mxu3 %v1270_v35 }
 0x6ac   :  { %v480_v14 = vpop.f32.mrf.mxu2  ;;  %v500_v15 = vpop.f32.mrf.mxu3 }
 0x6ad   :  { %v481_v16 = vadd.f32 %v480_v14, %v458_v12  ;;  %v501_v17 = vadd.f32 %v500_v15, %v459_v13  ;;  %v1511_v14 = vld [vmem:[#allocation2] ss:$0 sm:$0xff] }
 0x6af   :  { %v503_v18 = vadd.f32 %v481_v16, %v1338_v48  ;;  %v504_v19 = vadd.f32 %v501_v17, %v1340_v52 }
 0x6b1   :  { %1053 = vtanh.f32 %v503_v18 }
 0x6b2   :  { %1055 = vtanh.f32 %v504_v19 }
 0x6b7   :  { %v1054_v20 = vpop.eup %1053 }
 0x6b8   :  { %v507_v21 = vmul.f32 0.5, %v1054_v20  ;;  %v1056_v23 = vpop.eup %1055 }
 0x6b9   :  { %v509_v40 = vmul.f32 0.5, %v1056_v23 }
 0x6ba   :  { %v508_v22 = vadd.f32 0.5, %v507_v21 }
 0x6bb   :  { %v510_v41 = vadd.f32 0.5, %v509_v40 }
 0x6bc   :  { %v512_v36 = vmul.f32 %v1056_v23, %v508_v22  ;;  %v511_v37 = vmul.f32 %v508_v22, %v448_v0 }
 0x6be   :  { %514 = vrot.lane.b32.xlu1 %v512_v36, %s1137_s2 }
 0x730   :  { %v515_v38 = vpop.permute.xlu1 %514 }
 0x731   :  { %v517_v39 = vadd.f32 %v515_v38, %v511_v37 }
 0x733   :  { %1057 = vtanh.f32 %v517_v39 }
 0x739   :  { %v1058_v42 = vpop.eup %1057 }
 0x73a   :  { %v519_v43 = vmul.f32 %v1058_v42, %v510_v41 }
 0x73c   :  { %992 = vmatmul.msk.f32.vlgmr.msrb.gmra.mxu0 %vm114_vm0, %v519_v43  ;;  %993 = vmatmul.msk.f32.vlgmr.msrb.gmra.mxu1 %vm114_vm0, %v519_v43 }
 0x73d   :  { %894 = vmatpush.msrb.mxu0 %v1195_v4  ;;  %914 = vmatpush.msrb.mxu1 %v1197_v5  ;;  %v525_v4 = vpop.permute.xlu2 %524 }
 0x73e   :  { %v527_v5 = vmul.f32 %v525_v4, %v1210_v9 }
 0x73f   :  { %895 = vmatpush.msrb.mxu0 %v1199_v6  ;;  %915 = vmatpush.msrb.mxu1 %v1203_v7  ;;  %v528_v6 = vmul.f32 %v525_v4, %v1212_v10 }
 0x741   :  { %896 = vmatpush.msrb.mxu0 %v1230_v24  ;;  %916 = vmatpush.msrb.mxu1 %v1232_v25 }
 0x743   :  { %897 = vmatpush.msrb.mxu0 %v1236_v26  ;;  %917 = vmatpush.msrb.mxu1 %v1238_v27 }
 0x745   :  { %898 = vmatpush.msrb.mxu0 %v1240_v28  ;;  %918 = vmatpush.msrb.mxu1 %v1246_v29  ;;  %v1506_v3 = vpop.permute.xlu2 %651 }
 0x747   :  { %899 = vmatpush.msrb.mxu0 %v1248_v30  ;;  %919 = vmatpush.msrb.mxu1 %v1250_v31 }
 0x749   :  { %900 = vmatpush.msrb.mxu0 %v1260_v32  ;;  %920 = vmatpush.msrb.mxu1 %v1262_v33 }
 0x74b   :  { %901 = vmatpush.msrb.mxu0 %v1264_v34  ;;  %921 = vmatpush.msrb.mxu1 %v1270_v35 }
 0x7b9   :  { %v549_v7 = vpop.f32.mrf.mxu0  ;;  %v569_v24 = vpop.f32.mrf.mxu1 }
 0x7ba   :  { %v550_v25 = vadd.f32 %v549_v7, %v527_v5  ;;  %v570_v26 = vadd.f32 %v569_v24, %v528_v6 }
 0x7bc   :  { %v572_v27 = vadd.f32 %v550_v25, %v1338_v48  ;;  %v573_v28 = vadd.f32 %v570_v26, %v1340_v52 }
 0x7be   :  { %1059 = vtanh.f32 %v572_v27 }
 0x7bf   :  { %1061 = vtanh.f32 %v573_v28 }
 0x7c4   :  { %v1060_v29 = vpop.eup %1059 }
 0x7c5   :  { %v576_v30 = vmul.f32 0.5, %v1060_v29  ;;  %v1062_v32 = vpop.eup %1061 }
 0x7c6   :  { %v578_v45 = vmul.f32 0.5, %v1062_v32 }
 0x7c7   :  { %v577_v31 = vadd.f32 0.5, %v576_v30 }
 0x7c8   :  { %v579_v46 = vadd.f32 0.5, %v578_v45 }
 0x7c9   :  { %v581_v33 = vmul.f32 %v1062_v32, %v577_v31  ;;  %v580_v34 = vmul.f32 %v577_v31, %v517_v39 }
 0x7cb   :  { %583 = vrot.lane.b32.xlu0 %v581_v33, %s1137_s2 }
 0x83d   :  { %v584_v35 = vpop.permute.xlu0 %583 }
 0x83e   :  { %v586_v44 = vadd.f32 %v584_v35, %v580_v34 }
 0x840   :  { %1063 = vtanh.f32 %v586_v44 }
 0x846   :  { %v1064_v47 = vpop.eup %1063 }
 0x847   :  { %v588_v49 = vmul.f32 %v1064_v47, %v579_v46 }
 0x849   :  { %994 = vmatmul.msk.f32.vlgmr.msrb.gmra.mxu2 %vm114_vm0, %v588_v49  ;;  %995 = vmatmul.msk.f32.vlgmr.msrb.gmra.mxu3 %vm114_vm0, %v588_v49 }
 0x8cc   :  { %v609_v51 = vpop.f32.mrf.mxu2  ;;  %v629_v53 = vpop.f32.mrf.mxu3 }
 0x8cd   :  { %v632_v54 = vadd.f32 %v609_v51, %v1338_v48  ;;  %v633_v55 = vadd.f32 %v629_v53, %v1340_v52 }
 0x8cf   :  { %1065 = vtanh.f32 %v632_v54 }
 0x8d0   :  { %1067 = vtanh.f32 %v633_v55 }
 0x8d5   :  { %v1066_v56 = vpop.eup %1065 }
 0x8d6   :  { %v636_v57 = vmul.f32 0.5, %v1066_v56  ;;  %v1068_v59 = vpop.eup %1067 }
 0x8d7   :  { %v638_v0 = vmul.f32 0.5, %v1068_v59 }
 0x8d8   :  { %v637_v58 = vadd.f32 0.5, %v636_v57 }
 0x8d9   :  { %v639_v1 = vadd.f32 0.5, %v638_v0 }
 0x8da   :  { %v641_v60 = vmul.f32 %v1068_v59, %v637_v58  ;;  %v640_v61 = vmul.f32 %v637_v58, %v586_v44 }
 0x8dc   :  { %643 = vrot.lane.b32.xlu1 %v641_v60, %s1137_s2 }
 0x94e   :  { %v644_v62 = vpop.permute.xlu1 %643 }
 0x94f   :  { %v646_v63 = vadd.f32 %v644_v62, %v640_v61 }
 0x951   :  { %1069 = vtanh.f32 %v646_v63 }
 0x957   :  { %v1070_v2 = vpop.eup %1069 }
 0x958   :  { %v648_v8 = vmul.f32 %v1070_v2, %v639_v1 }
 0x95a   :  { %v654_v11 = vmul.f32 %v1506_v3, %v648_v8 }
 0x95c   :  { %656 = vrot.lane.b32.xlu0 %v654_v11, %s1139_s5 }
 0x9ce   :  { %v657_v12 = vpop.permute.xlu0 %656 }
 0x9cf   :  { %v660_v13 = vsel %vm659_vm1, %v657_v12, 0.0 }
 0x9d0   :  { %661 = vadd.xlane.f32.xlu1 %v660_v13 }
 0xa43   :  { %v662_v15 = vpop.xlane.xlu1 %661 }
 0xa44   :  { %v1514_v16 = vadd.f32 %v1511_v14, %v662_v15 }
 0xa46   :  { %669 = vperm.xlu2 %1014, %v1514_v16  }
 0xaa0   :  { %v670_v17 = vpop.permute.xlu2 %669 }
 0xaa1   :  { %v672_v18 = vmul.f32 %v670_v17, %v1210_v9  ;;  %v673_v19 = vmul.f32 %v670_v17, %v1212_v10 }
 0xaa3   :  { %v674_v20 = vadd.f32 %v672_v18, %v609_v51  ;;  %v675_v21 = vadd.f32 %v673_v19, %v629_v53 }
 0xaa5   :  { %v676_v22 = vadd.f32 %v674_v20, %v1338_v48  ;;  %v677_v23 = vadd.f32 %v675_v21, %v1340_v52 }
 0xaa7   :  { %1071 = vtanh.f32 %v676_v22 }
 0xaa8   :  { %1073 = vtanh.f32 %v677_v23 }
 0xaad   :  { %v1072_v36 = vpop.eup %1071 }
 0xaae   :  { %v680_v37 = vmul.f32 0.5, %v1072_v36  ;;  %v1074_v39 = vpop.eup %1073 }
 0xaaf   :  { %v682_v4 = vmul.f32 0.5, %v1074_v39 }
 0xab0   :  { %v681_v38 = vadd.f32 0.5, %v680_v37 }
 0xab1   :  { %v683_v5 = vadd.f32 0.5, %v682_v4 }
 0xab2   :  { %v685_v40 = vmul.f32 %v1074_v39, %v681_v38  ;;  %v684_v41 = vmul.f32 %v681_v38, %v586_v44 }
 0xab4   :  { %687 = vrot.lane.b32.xlu0 %v685_v40, %s1137_s2 }
 0xb26   :  { %v688_v42 = vpop.permute.xlu0 %687 }
 0xb27   :  { %v690_v43 = vadd.f32 %v688_v42, %v684_v41 }
 0xb29   :  { %1075 = vtanh.f32 %v690_v43 }
 0xb2f   :  { %v1076_v6 = vpop.eup %1075 }
 0xb30   :  { %v692_v7 = vmul.f32 %v1076_v6, %v683_v5 }
 0xb32   :  { %996 = vmatmul.msk.f32.vlgmr.msra.gmra.mxu0 %vm114_vm0, %v692_v7  ;;  %997 = vmatmul.msk.f32.vlgmr.msra.gmra.mxu1 %vm114_vm0, %v692_v7 }
 0xbaf   :  { %v713_v24 = vpop.f32.mrf.mxu0  ;;  %v733_v25 = vpop.f32.mrf.mxu1 }
 0xbb0   :  { %v736_v26 = vadd.f32 %v713_v24, %v1338_v48  ;;  %v737_v27 = vadd.f32 %v733_v25, %v1340_v52 }
 0xbb2   :  { %1077 = vtanh.f32 %v736_v26 }
 0xbb3   :  { %1079 = vtanh.f32 %v737_v27 }
 0xbb8   :  { %v1078_v28 = vpop.eup %1077 }
 0xbb9   :  { %v740_v29 = vmul.f32 0.5, %v1078_v28  ;;  %v1080_v31 = vpop.eup %1079 }
 0xbba   :  { %v742_v44 = vmul.f32 0.5, %v1080_v31 }
 0xbbb   :  { %v741_v30 = vadd.f32 0.5, %v740_v29 }
 0xbbc   :  { %v743_v45 = vadd.f32 0.5, %v742_v44 }
 0xbbd   :  { %v745_v32 = vmul.f32 %v1080_v31, %v741_v30  ;;  %v744_v33 = vmul.f32 %v741_v30, %v690_v43 }
 0xbbf   :  { %747 = vrot.lane.b32.xlu2 %v745_v32, %s1137_s2 }
 0xc19   :  { %v748_v34 = vpop.permute.xlu2 %747 }
 0xc1a   :  { %v750_v35 = vadd.f32 %v748_v34, %v744_v33 }
 0xc1c   :  { %1081 = vtanh.f32 %v750_v35 }
 0xc22   :  { %v1082_v46 = vpop.eup %1081 }
 0xc23   :  { %v752_v47 = vmul.f32 %v1082_v46, %v743_v45 }
 0xc25   :  { %v753_v49 = vmul.f32 %v752_v47, %v1506_v3 }
 0xc27   :  { %755 = vrot.lane.b32.xlu0 %v753_v49, %s1139_s5 }
 0xc99   :  { %v756_v50 = vpop.permute.xlu0 %755 }
 0xc9a   :  { %v758_v51 = vsel %vm659_vm1, %v756_v50, 0.0 }
 0xc9b   :  { %759 = vadd.xlane.f32.xlu2 %v758_v51 }
 0xd0e   :  { %v760_v53 = vpop.xlane.xlu2 %759 }
 0xd0f   :  { %v1531_v54 = vadd.f32 %v1511_v14, %v760_v53 }
 0xd11   :  { %764 = vperm.xlu0 %1012, %v1531_v54  }
 0xd83   :  { %v765_v55 = vpop.permute.xlu0 %764 }
 0xd84   :  { %v767_v56 = vmul.f32 %v765_v55, %v1210_v9  ;;  %v768_v57 = vmul.f32 %v765_v55, %v1212_v10 }
 0xd86   :  { %v769_v58 = vadd.f32 %v767_v56, %v713_v24  ;;  %v770_v59 = vadd.f32 %v768_v57, %v733_v25 }
 0xd88   :  { %v771_v60 = vadd.f32 %v769_v58, %v1338_v48  ;;  %v772_v61 = vadd.f32 %v770_v59, %v1340_v52 }
 0xd8a   :  { %1083 = vtanh.f32 %v771_v60 }
 0xd8b   :  { %1085 = vtanh.f32 %v772_v61 }
 0xd90   :  { %v1084_v62 = vpop.eup %1083 }
 0xd91   :  { %v775_v63 = vmul.f32 0.5, %v1084_v62  ;;  %v1086_v1 = vpop.eup %1085 }
 0xd92   :  { %v777_v13 = vmul.f32 0.5, %v1086_v1 }
 0xd93   :  { %v776_v0 = vadd.f32 0.5, %v775_v63 }
 0xd94   :  { %v778_v15 = vadd.f32 0.5, %v777_v13 }
 0xd95   :  { %v780_v2 = vmul.f32 %v1086_v1, %v776_v0  ;;  %v779_v8 = vmul.f32 %v776_v0, %v690_v43 }
 0xd97   :  { %782 = vrot.lane.b32.xlu0 %v780_v2, %s1137_s2 }
 0xe09   :  { %v783_v11 = vpop.permute.xlu0 %782 }
 0xe0a   :  { %v785_v12 = vadd.f32 %v783_v11, %v779_v8 }
 0xe0c   :  { %1087 = vtanh.f32 %v785_v12 }
 0xe12   :  { %v1088_v17 = vpop.eup %1087 }
 0xe13   :  { %v787_v18 = vmul.f32 %v1088_v17, %v778_v15 }
 0xe15   :  { %998 = vmatmul.msk.f32.vlgmr.msra.gmra.mxu2 %vm114_vm0, %v787_v18  ;;  %999 = vmatmul.msk.f32.vlgmr.msra.gmra.mxu3 %vm114_vm0, %v787_v18 }
 0xe98   :  { %v808_v19 = vpop.f32.mrf.mxu2  ;;  %v828_v20 = vpop.f32.mrf.mxu3 }
 0xe99   :  { %v831_v21 = vadd.f32 %v808_v19, %v1338_v48  ;;  %v832_v22 = vadd.f32 %v828_v20, %v1340_v52 }
 0xe9b   :  { %1089 = vtanh.f32 %v831_v21 }
 0xe9c   :  { %1091 = vtanh.f32 %v832_v22 }
 0xea1   :  { %v1090_v23 = vpop.eup %1089 }
 0xea2   :  { %v835_v36 = vmul.f32 0.5, %v1090_v23  ;;  %v1092_v38 = vpop.eup %1091 }
 0xea3   :  { %v837_v43 = vmul.f32 0.5, %v1092_v38 }
 0xea4   :  { %v836_v37 = vadd.f32 0.5, %v835_v36 }
 0xea5   :  { %v838_v4 = vadd.f32 0.5, %v837_v43 }
 0xea6   :  { %v840_v39 = vmul.f32 %v1092_v38, %v836_v37  ;;  %v839_v40 = vmul.f32 %v836_v37, %v785_v12 }
 0xea8   :  { %842 = vrot.lane.b32.xlu0 %v840_v39, %s1137_s2 }
 0xf1a   :  { %v843_v41 = vpop.permute.xlu0 %842 }
 0xf1b   :  { %v845_v42 = vadd.f32 %v843_v41, %v839_v40 }
 0xf1d   :  { %1093 = vtanh.f32 %v845_v42 }
 0xf23   :  { %v1094_v5 = vpop.eup %1093 }
 0xf24   :  { %v847_v6 = vmul.f32 %v1094_v5, %v838_v4 }
 0xf26   :  { %v848_v7 = vmul.f32 %v847_v6, %v1506_v3 }
 0xf28   :  { %850 = vrot.lane.b32.xlu1 %v848_v7, %s1139_s5 }
 0xf9a   :  { %v851_v24 = vpop.permute.xlu1 %850 }
 0xf9b   :  { %v853_v25 = vsel %vm659_vm1, %v851_v24, 0.0 }
 0xf9c   :  { %854 = vadd.xlane.f32.xlu0 %v853_v25 }
0x100f   :  { %v855_v26 = vpop.xlane.xlu0 %854 }
0x1010   :  { %v856_v27 = vadd.f32 %v1511_v14, %v855_v26 }
0x1012   :  { %953 = vrot.lane.b32.xlu0 %v856_v27, %s1140_s30  ;;  %859 = vperm.xlu2 %1014, %v856_v27  }
0x106c   :  { %v860_v28 = vpop.permute.xlu2 %859 }
0x106d   :  { %v862_v29 = vmul.f32 %v860_v28, %v1210_v9  ;;  %v863_v30 = vmul.f32 %v860_v28, %v1212_v10 }
0x106f   :  { %v864_v31 = vadd.f32 %v862_v29, %v808_v19  ;;  %v865_v32 = vadd.f32 %v863_v30, %v828_v20 }
0x1071   :  { %v866_v33 = vadd.f32 %v864_v31, %v1338_v48  ;;  %v867_v34 = vadd.f32 %v865_v32, %v1340_v52 }
0x1073   :  { %1095 = vtanh.f32 %v866_v33 }
0x1074   :  { %1097 = vtanh.f32 %v867_v34 }
0x1079   :  { %v1096_v35 = vpop.eup %1095 }
0x107a   :  { %v870_v44 = vmul.f32 0.5, %v1096_v35  ;;  %v1098_v46 = vpop.eup %1097 }
0x107b   :  { %v872_v10 = vmul.f32 0.5, %v1098_v46 }
0x107c   :  { %v871_v45 = vadd.f32 0.5, %v870_v44 }
0x107d   :  { %v873_v51 = vadd.f32 0.5, %v872_v10 }
0x107e   :  { %v875_v47 = vmul.f32 %v1098_v46, %v871_v45  ;;  %v874_v49 = vmul.f32 %v871_v45, %v785_v12 }
0x1080   :  { %877 = vrot.lane.b32.xlu1 %v875_v47, %s1137_s2 }
0x10f2   :  { %v878_v50 = vpop.permute.xlu1 %877 }
0x10f3   :  { %v880_v9 = vadd.f32 %v878_v50, %v874_v49 }
0x10f5   :  { %1099 = vtanh.f32 %v880_v9 }
0x10fb   :  { %v1100_v53 = vpop.eup %1099 }
0x10fc   :  { %v882_v55 = vmul.f32 %v1100_v53, %v873_v51 }
0x10fe   :  { %1000 = vmatmul.msk.f32.vlgmr.msrb.gmra.mxu0 %vm114_vm0, %v882_v55  ;;  %1001 = vmatmul.msk.f32.vlgmr.msrb.gmra.mxu1 %vm114_vm0, %v882_v55 }
0x117b   :  { %v903_v56 = vpop.f32.mrf.mxu0  ;;  %v923_v57 = vpop.f32.mrf.mxu1 }
0x117c   :  { %v904_v58 = vadd.f32 %v903_v56, %v1338_v48  ;;  %v924_v59 = vadd.f32 %v923_v57, %v1340_v52 }
0x117e   :  { %1101 = vtanh.f32 %v904_v58 }
0x117f   :  { %1103 = vtanh.f32 %v924_v59 }
0x1184   :  { %v1102_v60 = vpop.eup %1101 }
0x1185   :  { %v928_v61 = vmul.f32 0.5, %v1102_v60  ;;  %v1104_v63 = vpop.eup %1103 }
0x1186   :  { %v930_v11 = vmul.f32 0.5, %v1104_v63 }
0x1187   :  { %v929_v62 = vadd.f32 0.5, %v928_v61 }
0x1188   :  { %v931_v12 = vadd.f32 0.5, %v930_v11 }
0x1189   :  { %v933_v0 = vmul.f32 %v1104_v63, %v929_v62  ;;  %v932_v1 = vmul.f32 %v929_v62, %v880_v9 }
0x118b   :  { %935 = vrot.lane.b32.xlu1 %v933_v0, %s1137_s2 }
0x11fd   :  { %v936_v2 = vpop.permute.xlu1 %935 }
0x11fe   :  { %v938_v8 = vadd.f32 %v936_v2, %v932_v1 }
0x1200   :  { %1105 = vtanh.f32 %v938_v8 }
0x1206   :  { %v1106_v13 = vpop.eup %1105 }
0x1207   :  { %v940_v15 = vmul.f32 %v1106_v13, %v931_v12 }
0x1209   :  { %v941_v48 = vmul.f32 %v940_v15, %v1506_v3  ;;  %v954_v3 = vpop.permute.xlu0 %953 }
0x120b   :  { %943 = vrot.lane.b32.xlu2 %v941_v48, %s1139_s5 }
0x1213   :  { %950 = vrot.lane.b32.xlu2 %v1531_v54, %s1141_s8 }
0x1265   :  { %v944_v52 = vpop.permute.xlu2 %943 }
0x1266   :  { %v946_v17 = vsel %vm659_vm1, %v944_v52, 0.0 }
0x1267   :  { %947 = vadd.xlane.f32.xlu1 %v946_v17 }
0x126d   :  { %v951_v20 = vpop.permute.xlu2 %950 }
0x126e   :  { %v961_v21 = vsel %vm960_vm2, %v1514_v16, %v951_v20 }
0x126f   :  { %v963_v22 = vsel %vm962_vm3, %v961_v21, %v954_v3 }
0x12da   :  { %v948_v18 = vpop.xlane.xlu1 %947 }
0x12db   :  { %v949_v19 = vadd.f32 %v1511_v14, %v948_v18 }
0x12dd   :  { %957 = vrot.lane.b32.xlu2 %v949_v19, %s1142_s9 }
0x1337   :  { %v958_v23 = vpop.permute.xlu2 %957 }
0x1338   :  { %v965_v54 = vsel %vm964_vm4, %v963_v22, %v958_v23 }
0x1339   :  { %967 = vst.msk [vmem:[%s1574_s7] sm:$0xff] %vm966_vm5, %v965_v54 }
0x133a   :  { %972 = vsyncpa [#allocation4], 1 }

</bundles_post_ra>
